<compile_context>
chip_gen: v7x
topology: tpu7x:2x2x1
jax: 0.10.0
libtpu: 0.0.40
codegen_flags: <defaults>
</compile_context>

<pallas_src>
import jax
import jax.numpy as jnp
from jax.experimental import pallas as pl
from jax.experimental.pallas import tpu as pltpu


# ----------------------------------------------------------------------------
# Fused forward kernel: GCN layers + pooling + classifier, all in VMEM.
# ----------------------------------------------------------------------------
def _make_fused_kernel(num_layers, feat_dims):
    """feat_dims = [Fin, hidden_1, ..., hidden_L] — used to pick the cheaper
    matmul association per layer."""

    def kernel(*refs):
        x_ref, adj_ref, mask_ref = refs[0], refs[1], refs[2]
        p = 3
        layer_refs = []
        for _ in range(num_layers):
            layer_refs.append(refs[p:p + 4])   # (w, b, gamma, beta)
            p += 4
        (gw1_ref, gb1_ref, gw2t_ref, gb2_ref,
         cw1_ref, cb1_ref, cw2_ref, cb2_ref, o_ref) = refs[p:p + 9]

        # Adjacency cast once, reused for every layer's aggregation matmul.
        adj_bf = adj_ref[...].astype(jnp.bfloat16)

        h = x_ref[...]                                            # [N, Fin] f32
        for i, (w_ref, b_ref, g_ref, be_ref) in enumerate(layer_refs):
            fin, fout = feat_dims[i], feat_dims[i + 1]
            h_bf = h.astype(jnp.bfloat16)
            w_bf = w_ref[...].astype(jnp.bfloat16)
            if fin < fout:
                # (A @ X) @ W : fewer MACs when Fin < Fout.
                ax = jnp.dot(adj_bf, h_bf, preferred_element_type=jnp.float32)
                z = jnp.dot(ax.astype(jnp.bfloat16), w_bf,
                            preferred_element_type=jnp.float32)
            else:
                # A @ (X @ W) : fewer MACs when Fin >= Fout.
                xw = jnp.dot(h_bf, w_bf, preferred_element_type=jnp.float32)
                z = jnp.dot(adj_bf, xw.astype(jnp.bfloat16),
                            preferred_element_type=jnp.float32)
            z = z + b_ref[...]                                    # [N, Fout]

            # One-pass LayerNorm (f32 on the VPU): sum + sum-of-squares.
            inv_f = jnp.float32(1.0 / fout)
            s = jnp.sum(z, axis=-1, keepdims=True)
            ss = jnp.sum(z * z, axis=-1, keepdims=True)
            mean = s * inv_f
            var = ss * inv_f - mean * mean
            zn = (z - mean) * jax.lax.rsqrt(var + jnp.float32(1e-5))
            zn = zn * g_ref[...] + be_ref[...]
            h = jnp.maximum(zn, 0.0)                              # ReLU
            # dropout: identity in eval mode.

        # ---- GlobalAttention pooling ------------------------------------
        h_bf = h.astype(jnp.bfloat16)
        g1 = jnp.dot(h_bf, gw1_ref[...].astype(jnp.bfloat16),
                     preferred_element_type=jnp.float32) + gb1_ref[...]
        g1 = jnp.maximum(g1, 0.0)                                 # [N, P]
        # gate_nn final Linear(P,1) as a lane reduction (no 1-wide MXU pass).
        gate = (jnp.sum(g1 * gw2t_ref[...], axis=-1, keepdims=True)
                + gb2_ref[...])                                   # [N, 1] f32

        mask = mask_ref[...]                                      # [N, G]
        neg = jnp.float32(-1e30)
        scores = jnp.where(mask > 0, gate, neg)                   # [N, G]
        smax = jnp.max(scores, axis=0, keepdims=True)             # [1, G]
        e = jnp.where(mask > 0, jnp.exp(scores - smax), 0.0)      # [N, G]
        denom = jnp.sum(e, axis=0, keepdims=True)                 # [1, G]
        denom = jnp.maximum(denom, jnp.float32(1e-30))            # empty-graph guard
        attn = e / denom                                          # [N, G]

        # pooled[g, f] = sum_n attn[n, g] * h[n, f]
        pooled = jax.lax.dot_general(
            attn.astype(jnp.bfloat16), h_bf,
            dimension_numbers=(((0,), (0,)), ((), ())),
            preferred_element_type=jnp.float32,
        )                                                         # [G, F]

        # ---- classifier: Linear -> ReLU -> (dropout id) -> Linear(2) -----
        c1 = jnp.maximum(
            jnp.dot(pooled.astype(jnp.bfloat16),
                    cw1_ref[...].astype(jnp.bfloat16),
                    preferred_element_type=jnp.float32) + cb1_ref[...],
            0.0,
        )                                                         # [G, P]
        o_ref[...] = (
            jnp.dot(c1.astype(jnp.bfloat16),
                    cw2_ref[...].astype(jnp.bfloat16),
                    preferred_element_type=jnp.float32) + cb2_ref[...]
        )                                                         # [G, 2]

    return kernel


def multi_gnn_forward(x, adj, mask, params):
    conv_params = params["convs"]
    num_layers = len(conv_params)
    feat_dims = [x.shape[1]] + [w.shape[1] for (w, _, _, _) in conv_params]
    G = mask.shape[1]

    flat_inputs = [x, adj, mask]
    for lp in conv_params:
        flat_inputs.extend(lp)
    flat_inputs.extend([
        params["gw1"], params["gb1"], params["gw2t"], params["gb2"],
        params["cw1"], params["cb1"], params["cw2"], params["cb2"],
    ])

    # No grid, no blocking: every operand is placed whole in VMEM (single
    # buffer — avoids useless double-buffering for a one-shot kernel).
    # TODO(synk): for large N the dense [N,N] adjacency must instead be tiled
    # with a (row, k) grid + accumulator scratch, or replaced by a CSR
    # gather/scatter path with scalar prefetch.
    vmem = pl.BlockSpec(memory_space=pltpu.MemorySpace.VMEM)

    return pl.pallas_call(
        _make_fused_kernel(num_layers, feat_dims),
        out_shape=jax.ShapeDtypeStruct((G, 2), jnp.float32),
        in_specs=[vmem] * len(flat_inputs),
        out_specs=vmem,
    )(*flat_inputs)


# ----------------------------------------------------------------------------
# Glue: dense GCN-normalized adjacency + one-hot batch mask (plain JAX).
# ----------------------------------------------------------------------------
def build_gcn_adjacency(edge_index, num_nodes):
    A = jnp.zeros((num_nodes, num_nodes), jnp.float32)
    A = A.at[edge_index[1], edge_index[0]].set(1.0)
    A = jnp.maximum(A, A.T)                         # undirected
    A = A + jnp.eye(num_nodes, dtype=jnp.float32)   # self loops
    deg = A.sum(axis=1)
    dinv = jax.lax.rsqrt(deg)
    return A * dinv[:, None] * dinv[None, :]        # D^-1/2 (A+I) D^-1/2


if __name__ == "__main__":
    key = jax.random.PRNGKey(0)
    keys = jax.random.split(key, 16)

    # Small synthetic problem: 2 graphs of 32 nodes each.
    N, G = 64, 2
    Fin = 32                 # input_features
    hidden_sizes = [128, 128]
    P = 128                  # pool_hidden_size
    E_per = 64               # directed edges per graph (symmetrized)

    # Node features, edge_index [2, E], batch [N].
    x = jax.random.normal(keys[0], (N, Fin), jnp.float32)
    src0 = jax.random.randint(keys[1], (E_per,), 0, N // 2)
    dst0 = jax.random.randint(keys[2], (E_per,), 0, N // 2)
    src1 = jax.random.randint(keys[3], (E_per,), N // 2, N)
    dst1 = jax.random.randint(keys[4], (E_per,), N // 2, N)
    edge_index = jnp.stack(
        [jnp.concatenate([src0, src1]), jnp.concatenate([dst0, dst1])]
    )
    batch = jnp.concatenate(
        [jnp.zeros(N // 2, jnp.int32), jnp.ones(N // 2, jnp.int32)]
    )

    adj = build_gcn_adjacency(edge_index, N)                               # [N, N]
    mask = (batch[:, None] == jnp.arange(G)[None, :]).astype(jnp.float32)  # [N, G]

    def glorot(k, shape):
        lim = jnp.sqrt(6.0 / (shape[0] + shape[1]))
        return jax.random.uniform(k, shape, jnp.float32, -lim, lim)

    # Deterministic parameter init (shapes follow Multi_GNN.__init__ with GCN).
    convs = []
    fin = Fin
    for i, hdim in enumerate(hidden_sizes):
        w = glorot(keys[5 + i], (fin, hdim))
        b = jnp.zeros((1, hdim), jnp.float32)
        gamma = jnp.ones((1, hdim), jnp.float32)
        beta = jnp.zeros((1, hdim), jnp.float32)
        convs.append((w, b, gamma, beta))
        fin = hdim

    params = {
        "convs": convs,
        # GlobalAttention gate_nn: Linear(F,P) -> ReLU -> Linear(P,1)
        "gw1": glorot(keys[8], (fin, P)),
        "gb1": jnp.zeros((1, P), jnp.float32),
        "gw2t": glorot(keys[9], (P, 1)).reshape(1, P),   # stored transposed [1, P]
        "gb2": jnp.zeros((1, 1), jnp.float32),
        # classifier: Linear(F,P) -> ReLU -> Linear(P,2)
        "cw1": glorot(keys[10], (fin, P)),
        "cb1": jnp.zeros((1, P), jnp.float32),
        "cw2": glorot(keys[11], (P, 2)),
        "cb2": jnp.zeros((1, 2), jnp.float32),
    }

    out = multi_gnn_forward(x, adj, mask, params)   # [G, 2] logits
    jax.block_until_ready(out)
    print("KERNEL_OK")
</pallas_src>

<mosaic_0001>
module attributes {stable_mosaic.version = 11 : i64} {
  func.func @kernel(%arg0: memref<64x32xf32, #tpu.memory_space<vmem>>, %arg1: memref<64x64xf32, #tpu.memory_space<vmem>>, %arg2: memref<64x2xf32, #tpu.memory_space<vmem>>, %arg3: memref<32x128xf32, #tpu.memory_space<vmem>>, %arg4: memref<1x128xf32, #tpu.memory_space<vmem>>, %arg5: memref<1x128xf32, #tpu.memory_space<vmem>>, %arg6: memref<1x128xf32, #tpu.memory_space<vmem>>, %arg7: memref<128x128xf32, #tpu.memory_space<vmem>>, %arg8: memref<1x128xf32, #tpu.memory_space<vmem>>, %arg9: memref<1x128xf32, #tpu.memory_space<vmem>>, %arg10: memref<1x128xf32, #tpu.memory_space<vmem>>, %arg11: memref<128x128xf32, #tpu.memory_space<vmem>>, %arg12: memref<1x128xf32, #tpu.memory_space<vmem>>, %arg13: memref<1x128xf32, #tpu.memory_space<vmem>>, %arg14: memref<1x1xf32, #tpu.memory_space<vmem>>, %arg15: memref<128x128xf32, #tpu.memory_space<vmem>>, %arg16: memref<1x128xf32, #tpu.memory_space<vmem>>, %arg17: memref<128x2xf32, #tpu.memory_space<vmem>>, %arg18: memref<1x2xf32, #tpu.memory_space<vmem>>, %arg19: memref<2x2xf32, #tpu.memory_space<vmem>>) attributes {dimension_semantics = [], scalar_prefetch = 0 : i64, scratch_operands = 0 : i64, tpu.core_type = #tpu.core_type<tc>} {
    %c0 = arith.constant 0 : index
    %c0_0 = arith.constant 0 : index
    %0 = vector.load %arg1[%c0, %c0_0] : memref<64x64xf32, #tpu.memory_space<vmem>>, vector<64x64xf32>
    %1 = arith.truncf %0 : vector<64x64xf32> to vector<64x64xbf16>
    %c0_1 = arith.constant 0 : index
    %c0_2 = arith.constant 0 : index
    %2 = vector.load %arg0[%c0_1, %c0_2] : memref<64x32xf32, #tpu.memory_space<vmem>>, vector<64x32xf32>
    %3 = arith.truncf %2 : vector<64x32xf32> to vector<64x32xbf16>
    %c0_3 = arith.constant 0 : index
    %c0_4 = arith.constant 0 : index
    %4 = vector.load %arg3[%c0_3, %c0_4] : memref<32x128xf32, #tpu.memory_space<vmem>>, vector<32x128xf32>
    %5 = arith.truncf %4 : vector<32x128xf32> to vector<32x128xbf16>
    %cst = arith.constant dense<0.000000e+00> : vector<64x32xf32>
    %6 = tpu.matmul %1, %3, %cst {dimension_numbers = #tpu.dot_dimension_numbers<[1], [0], [0], [1], [0, 0, 1, 1], [], []>} : vector<64x64xbf16>, vector<64x32xbf16>, vector<64x32xf32> -> vector<64x32xf32>
    %7 = arith.truncf %6 : vector<64x32xf32> to vector<64x32xbf16>
    %cst_5 = arith.constant dense<0.000000e+00> : vector<64x128xf32>
    %8 = tpu.matmul %7, %5, %cst_5 {dimension_numbers = #tpu.dot_dimension_numbers<[1], [0], [0], [1], [0, 0, 1, 1], [], []>} : vector<64x32xbf16>, vector<32x128xbf16>, vector<64x128xf32> -> vector<64x128xf32>
    %c0_6 = arith.constant 0 : index
    %c0_7 = arith.constant 0 : index
    %9 = vector.load %arg4[%c0_6, %c0_7] : memref<1x128xf32, #tpu.memory_space<vmem>>, vector<1x128xf32>
    %10 = vector.broadcast %9 : vector<1x128xf32> to vector<64x128xf32>
    %11 = arith.addf %8, %10 : vector<64x128xf32>
    %cst_8 = arith.constant dense<0.000000e+00> : vector<64xf32>
    %12 = vector.multi_reduction <add>, %11, %cst_8 [1] : vector<64x128xf32> to vector<64xf32>
    %13 = vector.shape_cast %12 : vector<64xf32> to vector<64x1xf32>
    %14 = arith.mulf %11, %11 : vector<64x128xf32>
    %cst_9 = arith.constant dense<0.000000e+00> : vector<64xf32>
    %15 = vector.multi_reduction <add>, %14, %cst_9 [1] : vector<64x128xf32> to vector<64xf32>
    %16 = vector.shape_cast %15 : vector<64xf32> to vector<64x1xf32>
    %cst_10 = arith.constant 7.812500e-03 : f32
    %17 = vector.broadcast %cst_10 : f32 to vector<64x1xf32>
    %18 = arith.mulf %13, %17 : vector<64x1xf32>
    %cst_11 = arith.constant 7.812500e-03 : f32
    %19 = vector.broadcast %cst_11 : f32 to vector<64x1xf32>
    %20 = arith.mulf %16, %19 : vector<64x1xf32>
    %21 = arith.mulf %18, %18 : vector<64x1xf32>
    %22 = arith.subf %20, %21 : vector<64x1xf32>
    %23 = vector.broadcast %18 : vector<64x1xf32> to vector<64x128xf32>
    %24 = arith.subf %11, %23 : vector<64x128xf32>
    %cst_12 = arith.constant 9.99999974E-6 : f32
    %25 = vector.broadcast %cst_12 : f32 to vector<64x1xf32>
    %26 = arith.addf %22, %25 : vector<64x1xf32>
    %27 = math.rsqrt %26 : vector<64x1xf32>
    %28 = vector.broadcast %27 : vector<64x1xf32> to vector<64x128xf32>
    %29 = arith.mulf %24, %28 : vector<64x128xf32>
    %c0_13 = arith.constant 0 : index
    %c0_14 = arith.constant 0 : index
    %30 = vector.load %arg5[%c0_13, %c0_14] : memref<1x128xf32, #tpu.memory_space<vmem>>, vector<1x128xf32>
    %31 = vector.broadcast %30 : vector<1x128xf32> to vector<64x128xf32>
    %32 = arith.mulf %29, %31 : vector<64x128xf32>
    %c0_15 = arith.constant 0 : index
    %c0_16 = arith.constant 0 : index
    %33 = vector.load %arg6[%c0_15, %c0_16] : memref<1x128xf32, #tpu.memory_space<vmem>>, vector<1x128xf32>
    %34 = vector.broadcast %33 : vector<1x128xf32> to vector<64x128xf32>
    %35 = arith.addf %32, %34 : vector<64x128xf32>
    %cst_17 = arith.constant 0.000000e+00 : f32
    %36 = vector.broadcast %cst_17 : f32 to vector<64x128xf32>
    %37 = arith.maximumf %35, %36 : vector<64x128xf32>
    %38 = arith.truncf %37 : vector<64x128xf32> to vector<64x128xbf16>
    %c0_18 = arith.constant 0 : index
    %c0_19 = arith.constant 0 : index
    %39 = vector.load %arg7[%c0_18, %c0_19] : memref<128x128xf32, #tpu.memory_space<vmem>>, vector<128x128xf32>
    %40 = arith.truncf %39 : vector<128x128xf32> to vector<128x128xbf16>
    %cst_20 = arith.constant dense<0.000000e+00> : vector<64x128xf32>
    %41 = tpu.matmul %38, %40, %cst_20 {dimension_numbers = #tpu.dot_dimension_numbers<[1], [0], [0], [1], [0, 0, 1, 1], [], []>} : vector<64x128xbf16>, vector<128x128xbf16>, vector<64x128xf32> -> vector<64x128xf32>
    %42 = arith.truncf %41 : vector<64x128xf32> to vector<64x128xbf16>
    %cst_21 = arith.constant dense<0.000000e+00> : vector<64x128xf32>
    %43 = tpu.matmul %1, %42, %cst_21 {dimension_numbers = #tpu.dot_dimension_numbers<[1], [0], [0], [1], [0, 0, 1, 1], [], []>} : vector<64x64xbf16>, vector<64x128xbf16>, vector<64x128xf32> -> vector<64x128xf32>
    %c0_22 = arith.constant 0 : index
    %c0_23 = arith.constant 0 : index
    %44 = vector.load %arg8[%c0_22, %c0_23] : memref<1x128xf32, #tpu.memory_space<vmem>>, vector<1x128xf32>
    %45 = vector.broadcast %44 : vector<1x128xf32> to vector<64x128xf32>
    %46 = arith.addf %43, %45 : vector<64x128xf32>
    %cst_24 = arith.constant dense<0.000000e+00> : vector<64xf32>
    %47 = vector.multi_reduction <add>, %46, %cst_24 [1] : vector<64x128xf32> to vector<64xf32>
    %48 = vector.shape_cast %47 : vector<64xf32> to vector<64x1xf32>
    %49 = arith.mulf %46, %46 : vector<64x128xf32>
    %cst_25 = arith.constant dense<0.000000e+00> : vector<64xf32>
    %50 = vector.multi_reduction <add>, %49, %cst_25 [1] : vector<64x128xf32> to vector<64xf32>
    %51 = vector.shape_cast %50 : vector<64xf32> to vector<64x1xf32>
    %cst_26 = arith.constant 7.812500e-03 : f32
    %52 = vector.broadcast %cst_26 : f32 to vector<64x1xf32>
    %53 = arith.mulf %48, %52 : vector<64x1xf32>
    %cst_27 = arith.constant 7.812500e-03 : f32
    %54 = vector.broadcast %cst_27 : f32 to vector<64x1xf32>
    %55 = arith.mulf %51, %54 : vector<64x1xf32>
    %56 = arith.mulf %53, %53 : vector<64x1xf32>
    %57 = arith.subf %55, %56 : vector<64x1xf32>
    %58 = vector.broadcast %53 : vector<64x1xf32> to vector<64x128xf32>
    %59 = arith.subf %46, %58 : vector<64x128xf32>
    %cst_28 = arith.constant 9.99999974E-6 : f32
    %60 = vector.broadcast %cst_28 : f32 to vector<64x1xf32>
    %61 = arith.addf %57, %60 : vector<64x1xf32>
    %62 = math.rsqrt %61 : vector<64x1xf32>
    %63 = vector.broadcast %62 : vector<64x1xf32> to vector<64x128xf32>
    %64 = arith.mulf %59, %63 : vector<64x128xf32>
    %c0_29 = arith.constant 0 : index
    %c0_30 = arith.constant 0 : index
    %65 = vector.load %arg9[%c0_29, %c0_30] : memref<1x128xf32, #tpu.memory_space<vmem>>, vector<1x128xf32>
    %66 = vector.broadcast %65 : vector<1x128xf32> to vector<64x128xf32>
    %67 = arith.mulf %64, %66 : vector<64x128xf32>
    %c0_31 = arith.constant 0 : index
    %c0_32 = arith.constant 0 : index
    %68 = vector.load %arg10[%c0_31, %c0_32] : memref<1x128xf32, #tpu.memory_space<vmem>>, vector<1x128xf32>
    %69 = vector.broadcast %68 : vector<1x128xf32> to vector<64x128xf32>
    %70 = arith.addf %67, %69 : vector<64x128xf32>
    %cst_33 = arith.constant 0.000000e+00 : f32
    %71 = vector.broadcast %cst_33 : f32 to vector<64x128xf32>
    %72 = arith.maximumf %70, %71 : vector<64x128xf32>
    %73 = arith.truncf %72 : vector<64x128xf32> to vector<64x128xbf16>
    %c0_34 = arith.constant 0 : index
    %c0_35 = arith.constant 0 : index
    %74 = vector.load %arg11[%c0_34, %c0_35] : memref<128x128xf32, #tpu.memory_space<vmem>>, vector<128x128xf32>
    %75 = arith.truncf %74 : vector<128x128xf32> to vector<128x128xbf16>
    %cst_36 = arith.constant dense<0.000000e+00> : vector<64x128xf32>
    %76 = tpu.matmul %73, %75, %cst_36 {dimension_numbers = #tpu.dot_dimension_numbers<[1], [0], [0], [1], [0, 0, 1, 1], [], []>} : vector<64x128xbf16>, vector<128x128xbf16>, vector<64x128xf32> -> vector<64x128xf32>
    %c0_37 = arith.constant 0 : index
    %c0_38 = arith.constant 0 : index
    %77 = vector.load %arg12[%c0_37, %c0_38] : memref<1x128xf32, #tpu.memory_space<vmem>>, vector<1x128xf32>
    %78 = vector.broadcast %77 : vector<1x128xf32> to vector<64x128xf32>
    %79 = arith.addf %76, %78 : vector<64x128xf32>
    %cst_39 = arith.constant 0.000000e+00 : f32
    %80 = vector.broadcast %cst_39 : f32 to vector<64x128xf32>
    %81 = arith.maximumf %79, %80 : vector<64x128xf32>
    %c0_40 = arith.constant 0 : index
    %c0_41 = arith.constant 0 : index
    %82 = vector.load %arg13[%c0_40, %c0_41] : memref<1x128xf32, #tpu.memory_space<vmem>>, vector<1x128xf32>
    %83 = vector.broadcast %82 : vector<1x128xf32> to vector<64x128xf32>
    %84 = arith.mulf %81, %83 : vector<64x128xf32>
    %cst_42 = arith.constant dense<0.000000e+00> : vector<64xf32>
    %85 = vector.multi_reduction <add>, %84, %cst_42 [1] : vector<64x128xf32> to vector<64xf32>
    %86 = vector.shape_cast %85 : vector<64xf32> to vector<64x1xf32>
    %c0_43 = arith.constant 0 : index
    %c0_44 = arith.constant 0 : index
    %87 = vector.load %arg14[%c0_43, %c0_44] : memref<1x1xf32, #tpu.memory_space<vmem>>, vector<1x1xf32>
    %88 = vector.broadcast %87 : vector<1x1xf32> to vector<64x1xf32>
    %89 = arith.addf %86, %88 : vector<64x1xf32>
    %c0_45 = arith.constant 0 : index
    %c0_46 = arith.constant 0 : index
    %90 = vector.load %arg2[%c0_45, %c0_46] : memref<64x2xf32, #tpu.memory_space<vmem>>, vector<64x2xf32>
    %cst_47 = arith.constant 0.000000e+00 : f32
    %91 = vector.broadcast %cst_47 : f32 to vector<64x2xf32>
    %92 = arith.cmpf ogt, %90, %91 : vector<64x2xf32>
    %cst_48 = arith.constant -1.000000e+30 : f32
    %93 = vector.shape_cast %89 : vector<64x1xf32> to vector<64x1xf32>
    %94 = vector.broadcast %93 : vector<64x1xf32> to vector<64x2xf32>
    %95 = vector.broadcast %cst_48 : f32 to vector<64x2xf32>
    %96 = arith.select %92, %94, %95 : vector<64x2xi1>, vector<64x2xf32>
    %cst_49 = arith.constant dense<0xFF800000> : vector<2xf32>
    %97 = vector.multi_reduction <maximumf>, %96, %cst_49 [0] : vector<64x2xf32> to vector<2xf32>
    %98 = vector.shape_cast %97 : vector<2xf32> to vector<1x2xf32>
    %cst_50 = arith.constant 0.000000e+00 : f32
    %99 = vector.broadcast %cst_50 : f32 to vector<64x2xf32>
    %100 = arith.cmpf ogt, %90, %99 : vector<64x2xf32>
    %101 = vector.broadcast %98 : vector<1x2xf32> to vector<64x2xf32>
    %102 = arith.subf %96, %101 : vector<64x2xf32>
    %103 = math.exp %102 : vector<64x2xf32>
    %cst_51 = arith.constant 0.000000e+00 : f32
    %104 = vector.broadcast %cst_51 : f32 to vector<64x2xf32>
    %105 = arith.select %100, %103, %104 : vector<64x2xi1>, vector<64x2xf32>
    %cst_52 = arith.constant dense<0.000000e+00> : vector<2xf32>
    %106 = vector.multi_reduction <add>, %105, %cst_52 [0] : vector<64x2xf32> to vector<2xf32>
    %107 = vector.shape_cast %106 : vector<2xf32> to vector<1x2xf32>
    %cst_53 = arith.constant 1.000000e-30 : f32
    %108 = vector.broadcast %cst_53 : f32 to vector<1x2xf32>
    %109 = arith.maximumf %107, %108 : vector<1x2xf32>
    %110 = vector.broadcast %109 : vector<1x2xf32> to vector<64x2xf32>
    %111 = arith.divf %105, %110 : vector<64x2xf32>
    %112 = arith.truncf %111 : vector<64x2xf32> to vector<64x2xbf16>
    %cst_54 = arith.constant dense<0.000000e+00> : vector<2x128xf32>
    %113 = tpu.matmul %112, %73, %cst_54 {dimension_numbers = #tpu.dot_dimension_numbers<[0], [0], [1], [1], [0, 1, 1, 1], [], []>} : vector<64x2xbf16>, vector<64x128xbf16>, vector<2x128xf32> -> vector<2x128xf32>
    %114 = arith.truncf %113 : vector<2x128xf32> to vector<2x128xbf16>
    %c0_55 = arith.constant 0 : index
    %c0_56 = arith.constant 0 : index
    %115 = vector.load %arg15[%c0_55, %c0_56] : memref<128x128xf32, #tpu.memory_space<vmem>>, vector<128x128xf32>
    %116 = arith.truncf %115 : vector<128x128xf32> to vector<128x128xbf16>
    %cst_57 = arith.constant dense<0.000000e+00> : vector<2x128xf32>
    %117 = tpu.matmul %114, %116, %cst_57 {dimension_numbers = #tpu.dot_dimension_numbers<[1], [0], [0], [1], [0, 0, 1, 1], [], []>} : vector<2x128xbf16>, vector<128x128xbf16>, vector<2x128xf32> -> vector<2x128xf32>
    %c0_58 = arith.constant 0 : index
    %c0_59 = arith.constant 0 : index
    %118 = vector.load %arg16[%c0_58, %c0_59] : memref<1x128xf32, #tpu.memory_space<vmem>>, vector<1x128xf32>
    %119 = vector.broadcast %118 : vector<1x128xf32> to vector<2x128xf32>
    %120 = arith.addf %117, %119 : vector<2x128xf32>
    %cst_60 = arith.constant 0.000000e+00 : f32
    %121 = vector.broadcast %cst_60 : f32 to vector<2x128xf32>
    %122 = arith.maximumf %120, %121 : vector<2x128xf32>
    %123 = arith.truncf %122 : vector<2x128xf32> to vector<2x128xbf16>
    %c0_61 = arith.constant 0 : index
    %c0_62 = arith.constant 0 : index
    %124 = vector.load %arg17[%c0_61, %c0_62] : memref<128x2xf32, #tpu.memory_space<vmem>>, vector<128x2xf32>
    %125 = arith.truncf %124 : vector<128x2xf32> to vector<128x2xbf16>
    %cst_63 = arith.constant dense<0.000000e+00> : vector<2x2xf32>
    %126 = tpu.matmul %123, %125, %cst_63 {dimension_numbers = #tpu.dot_dimension_numbers<[1], [0], [0], [1], [0, 0, 1, 1], [], []>} : vector<2x128xbf16>, vector<128x2xbf16>, vector<2x2xf32> -> vector<2x2xf32>
    %c0_64 = arith.constant 0 : index
    %c0_65 = arith.constant 0 : index
    %127 = vector.load %arg18[%c0_64, %c0_65] : memref<1x2xf32, #tpu.memory_space<vmem>>, vector<1x2xf32>
    %128 = vector.broadcast %127 : vector<1x2xf32> to vector<2x2xf32>
    %129 = arith.addf %126, %128 : vector<2x2xf32>
    %c0_66 = arith.constant 0 : index
    %c0_67 = arith.constant 0 : index
    %130 = vector.load %arg19[%c0_66, %c0_67] : memref<2x2xf32, #tpu.memory_space<vmem>>, vector<2x2xf32>
    tpu.vector_store %arg19[%c0_66, %c0_67], %129 {strides = array<i32>} : memref<2x2xf32, #tpu.memory_space<vmem>>, vector<2x2xf32>,
    return
  }
}

</mosaic_0001>

<bundles_post_ra>
// kernel: tpu_custom_call.1
= control target key start
LH: loop header
LB: loop body
LE: loop exit
PB: predicated region body
PF: predicated region fallthrough
CT: control target
= control target key end

     0   :  { %s2293_s0 = inlined_call_operand.vmem [shape: f32[64,32], index: 0, kind: input, shape index: {}]   ;;  %s2294_s1 = inlined_call_operand.hbm [shape: f32[64,64], index: 1, kind: input, shape index: {}]   ;;  %s2295_s2 = inlined_call_operand.vmem [shape: f32[64,2], index: 2, kind: input, shape index: {}]   ;;  %s2296_s3 = inlined_call_operand.vmem [shape: f32[32,128], index: 3, kind: input, shape index: {}]   ;;  %s2297_s4 = inlined_call_operand.vmem [shape: f32[1,128], index: 4, kind: input, shape index: {}]   ;;  %s2298_s5 = inlined_call_operand.vmem [shape: f32[1,128], index: 5, kind: input, shape index: {}]   ;;  %s2299_s6 = inlined_call_operand.vmem [shape: f32[1,128], index: 6, kind: input, shape index: {}]   ;;  %s2300_s7 = inlined_call_operand.vmem [shape: f32[128,128], index: 7, kind: input, shape index: {}]   ;;  %s2301_s8 = inlined_call_operand.vmem [shape: f32[1,128], index: 8, kind: input, shape index: {}]   ;;  %s2302_s9 = inlined_call_operand.vmem [shape: f32[1,128], index: 9, kind: input, shape index: {}]   ;;  %s2303_s10 = inlined_call_operand.vmem [shape: f32[1,128], index: 10, kind: input, shape index: {}]   ;;  %s2304_s11 = inlined_call_operand.vmem [shape: f32[128,128], index: 11, kind: input, shape index: {}]   ;;  %s2305_s12 = inlined_call_operand.vmem [shape: f32[1,128], index: 12, kind: input, shape index: {}]   ;;  %s2306_s13 = inlined_call_operand.vmem [shape: f32[1,128], index: 13, kind: input, shape index: {}]   ;;  %s2307_s14 = inlined_call_operand.<no memory space> [shape: f32[1,1], index: 14, kind: input, shape index: {}]   ;;  %s2308_s15 = inlined_call_operand.hbm [shape: f32[128,128], index: 15, kind: input, shape index: {}]   ;;  %s2309_s16 = inlined_call_operand.vmem [shape: f32[1,128], index: 16, kind: input, shape index: {}]   ;;  %s2310_s17 = inlined_call_operand.vmem [shape: f32[128,2], index: 17, kind: input, shape index: {}]   ;;  %s2311_s18 = inlined_call_operand.vmem [shape: f32[1,2], index: 18, kind: input, shape index: {}]   ;;  %s2312_s19 = inlined_call_operand.hbm [shape: f32[2,2], index: 19, kind: output, shape index: {}]  }
   0x1   :  { %2317 = sst [smem:[#allocation12_spill]] %s2293_s0  ;;  %v24_v0 = vstv %s2307_s14 }
   0x2   :  { %2318 = sst [smem:[#allocation13_spill]] %s2294_s1  ;;  %25 = vst [vmem:[#allocation2] sm:$0x1] %v24_v0 }
   0x3   :  { %2319 = sst [smem:[#allocation14_spill]] %s2295_s2 }
   0x4   :  { %2320 = sst [smem:[#allocation15_spill]] %s2296_s3 }
   0x5   :  { %26 = vsyncpa [#allocation4], 0 }
   0x6   :  { %27 = vsyncpa [#allocation7], 0 }
   0x7   :  { %28 = vsyncpa [#allocation5], 0  ;;  %s1642_s20 = smov [#allocation3]   ;;  %s2321_s2 = sld [smem:[#allocation13_spill]] }
   0x8   :  { %s36_s21 = sshll.u32 %s1642_s20, 4  ;;  %s37_s21 = int_to_ptr.vmem [resolvable:$true] %s36_s21 }
   0xd   :  { %s1570_s23 = scalar_lea.hbm %s2321_s2, 1024 }
   0xe   :  { %p1571_p0 = scmp.ne.s32.totalorder %s2321_s2, %s1570_s23  ;;  %p1574_p1 = scmp.lt.u32.totalorder %s1570_s23, %s2321_s2 }
  0x10   :  { %p1576_p2 = pnand %p1574_p1, %p1571_p0 }
  0x12   :  { %1579 = shalt.err (!%p1576_p2)
}
  0x13   :  { %s1580_s14 = scalar_lea.vmem %s37_s21, 1024  ;;  %p1585_p4 = scmp.lt.s32.totalorder %s37_s21, %s37_s21 }
  0x14   :  { %p1581_p3 = scmp.ne.s32.totalorder %s37_s21, %s1580_s14  ;;  %p1586_p5 = scmp.lt.s32.totalorder %s1580_s14, %s1580_s14 }
  0x16   :  { %p1587_p6 = por %p1586_p5, %p1585_p4 }
  0x18   :  { %p1588_p7 = pnand %p1587_p6, %p1581_p3 }
  0x1a   :  { %1591 = shalt.err (!%p1588_p7)
}
  0x1b   :  { %s1643_s27 = smov 128   ;;  %s1644_s28 = smov 8  }
  0x1c   :  { %42 = dma.hbm_to_vmem [thread:$0]  %s2321_s2, 1024, %s37_s21, [#allocation4], %s1643_s27, %s1643_s27, %s1644_s28  }
  0x1d   :  { %s1645_s30 = smov [#allocation6]   ;;  %s1592_s23 = scalar_lea.hbm %s2308_s15, 2048 }
  0x1e   :  { %s74_s20 = sshll.u32 %s1645_s30, 4  ;;  %p1593_p8 = scmp.ne.s32.totalorder %s2308_s15, %s1592_s23  ;;  %s75_s20 = int_to_ptr.vmem [resolvable:$true] %s74_s20 }
  0x1f   :  { %p1596_p9 = scmp.lt.u32.totalorder %s1592_s23, %s2308_s15 }
  0x21   :  { %p1598_p10 = pnand %p1596_p9, %p1593_p8 }
  0x23   :  { %1601 = shalt.err (!%p1598_p10)
}
  0x24   :  { %s1602_s14 = scalar_lea.vmem %s75_s20, 2048  ;;  %p1607_p12 = scmp.lt.s32.totalorder %s75_s20, %s75_s20 }
  0x25   :  { %p1603_p11 = scmp.ne.s32.totalorder %s75_s20, %s1602_s14  ;;  %p1608_p13 = scmp.lt.s32.totalorder %s1602_s14, %s1602_s14 }
  0x27   :  { %p1609_p0 = por %p1608_p13, %p1607_p12 }
  0x29   :  { %p1610_p1 = pnand %p1609_p0, %p1603_p11 }
  0x2b   :  { %1613 = shalt.err (!%p1610_p1)
}
  0x2c   :  { %80 = dma.hbm_to_vmem [thread:$0]  %s2308_s15, 2048, %s75_s20, [#allocation7], %s1643_s27, %s1643_s27, %s1644_s28  }
  0x2d   :  { %1636 = dma.done.wait [#allocation4], 1024  }
  0x2e   :  { %1637 = vsyncadd [#allocation4], 4294966272 }
  0x2f   :  { %1638 = dma.done.wait [#allocation7], 2048  }
  0x30   :  { %1639 = vsyncadd [#allocation7], 4294965248  ;;  %s2322_s30 = sld [smem:[#allocation12_spill]]  ;;  %v94_v9 = vld [vmem:[#allocation3] sm:$0xff]  ;;  %v95_v10 = vld [vmem:[#allocation3 + $0x8] sm:$0xff]  ;;  %vm124_vm0 = vcmask 523264  }
  0x31   :  { %v102_v11 = vpack.c.bf16 %v95_v10, %v94_v9  ;;  %s2323_s21 = sld [smem:[#allocation15_spill]]  ;;  %v96_v19 = vld [vmem:[#allocation3 + $0x10] sm:$0xff]  ;;  %v97_v20 = vld [vmem:[#allocation3 + $0x18] sm:$0xff]  ;;  %v98_v21 = vld [vmem:[#allocation3 + $0x20] sm:$0xff]  ;;  %vm213_vm1 = vcmask 261120   ;;  %vm1648_vm2 = vmmov 0  }
  0x32   :  { %v99_v22 = vld [vmem:[#allocation3 + $0x28] sm:$0xff]  ;;  %v1808_v23 = vpack.c.bf16 %v97_v20, %v96_v19  ;;  %v100_v25 = vld [vmem:[#allocation3 + $0x30] sm:$0xff]  ;;  %v101_v26 = vld [vmem:[#allocation3 + $0x38] sm:$0xff]  ;;  %s2324_s24 = sld [smem:[#allocation14_spill]]  ;;  %vm962_vm7 = vcmask 15360   ;;  %vm1255_vm12 = vcmask 9216  }
  0x33   :  { %1374 = vmatprep.mubr.msk.bf16.mxu0 %vm124_vm0, %v102_v11  ;;  %v1810_v24 = vpack.c.bf16 %v99_v22, %v98_v21  ;;  %v1816_v27 = vpack.c.bf16 %v101_v26, %v100_v25  ;;  %v1277_v43 = vld [vmem:[%s2297_s4] ss:$0 sm:$0xff]  ;;  %v447_v19 = vld [vmem:[%s2300_s7 + $0x50] sm:$0xff]  ;;  %v448_v20 = vld [vmem:[%s2300_s7 + $0x58] sm:$0xff] }
  0x34   :  { %v437_v0 = vld [vmem:[%s2300_s7] sm:$0xff]  ;;  %v458_v21 = vpack.c.bf16 %v448_v20, %v447_v19  ;;  %v450_v25 = vld [vmem:[%s2300_s7 + $0x68] sm:$0xff] }
  0x35   :  { %v441_v10 = vld [vmem:[%s2300_s7 + $0x20] sm:$0xff] }
  0x36   :  { %v106_v1 = vld [vmem:[%s2322_s30] sm:$0xff]  ;;  %v107_v2 = vld [vmem:[%s2322_s30 + $0x8] sm:$0xff]  ;;  %v108_v3 = vld [vmem:[%s2322_s30 + $0x10] sm:$0xff] }
  0x37   :  { %v114_v4 = vpack.c.bf16 %v107_v2, %v106_v1  ;;  %v109_v5 = vld [vmem:[%s2322_s30 + $0x18] sm:$0xff]  ;;  %v110_v7 = vld [vmem:[%s2322_s30 + $0x20] sm:$0xff]  ;;  %v111_v8 = vld [vmem:[%s2322_s30 + $0x28] sm:$0xff] }
  0x38   :  { %v115_v6 = vpack.c.bf16 %v109_v5, %v108_v3  ;;  %v116_v12 = vpack.c.bf16 %v111_v8, %v110_v7  ;;  %v118_v13 = vld [vmem:[%s2323_s21] sm:$0xff]  ;;  %v119_v14 = vld [vmem:[%s2323_s21 + $0x8] sm:$0xff]  ;;  %v112_v15 = vld [vmem:[%s2322_s30 + $0x30] sm:$0xff] }
  0x39   :  { %1366 = vmatprep.subr.bf16.mxu0 %v114_v4  ;;  %v113_v16 = vld [vmem:[%s2322_s30 + $0x38] sm:$0xff]  ;;  %v122_v17 = vpack.c.bf16 %v119_v14, %v118_v13  ;;  %v120_v28 = vld [vmem:[%s2323_s21 + $0x10] sm:$0xff]  ;;  %v438_v1 = vld [vmem:[%s2300_s7 + $0x8] sm:$0xff] }
  0x3a   :  { %1367 = vmatpush3.bf16.msra.mxu0 %v114_v4  ;;  %v117_v18 = vpack.c.bf16 %v113_v16, %v112_v15  ;;  %v121_v29 = vld [vmem:[%s2323_s21 + $0x18] sm:$0xff]  ;;  %v453_v2 = vpack.c.bf16 %v438_v1, %v437_v0  ;;  %v439_v5 = vld [vmem:[%s2300_s7 + $0x10] sm:$0xff]  ;;  %v445_v16 = vld [vmem:[%s2300_s7 + $0x40] sm:$0xff] }
  0x3b   :  { %1368 = vmatprep.subr.bf16.mxu0 %v115_v6  ;;  %1382 = vmatprep.subr.bf16.mxu1 %v122_v17  ;;  %v123_v30 = vpack.c.bf16 %v121_v29, %v120_v28  ;;  %v443_v13 = vld [vmem:[%s2300_s7 + $0x30] sm:$0xff]  ;;  %v444_v14 = vld [vmem:[%s2300_s7 + $0x38] sm:$0xff]  ;;  %v449_v22 = vld [vmem:[%s2300_s7 + $0x60] sm:$0xff] }
  0x3c   :  { %1383 = vmatpush3.bf16.msra.mxu1 %v122_v17  ;;  %v456_v15 = vpack.c.bf16 %v444_v14, %v443_v13  ;;  %v446_v17 = vld [vmem:[%s2300_s7 + $0x48] sm:$0xff]  ;;  %v459_v26 = vpack.c.bf16 %v450_v25, %v449_v22  ;;  %v451_v28 = vld [vmem:[%s2300_s7 + $0x70] sm:$0xff]  ;;  %v452_v29 = vld [vmem:[%s2300_s7 + $0x78] sm:$0xff] }
  0x3d   :  { %1384 = vmatprep.subr.bf16.mxu1 %v123_v30 }
  0x3e   :  { %1369 = vmatpush3.bf16.msra.mxu0 %v115_v6  ;;  %v440_v6 = vld [vmem:[%s2300_s7 + $0x18] sm:$0xff] }
  0x3f   :  { %1370 = vmatprep.subr.bf16.mxu0 %v116_v12  ;;  %v454_v7 = vpack.c.bf16 %v440_v6, %v439_v5 }
  0x40   :  { %1385 = vmatpush3.bf16.msra.mxu1 %v123_v30  ;;  %v460_v30 = vpack.c.bf16 %v452_v29, %v451_v28 }
  0x41   :  { %1394 = vmatprep.subr.bf16.mxu1 %v453_v2 }
  0x42   :  { %1371 = vmatpush3.bf16.msra.mxu0 %v116_v12 }
  0x43   :  { %1372 = vmatprep.subr.bf16.mxu0 %v117_v18 }
  0x46   :  { %1373 = vmatpush3.bf16.msra.mxu0 %v117_v18  ;;  %v457_v18 = vpack.c.bf16 %v446_v17, %v445_v16 }
  0x49   :  { %1375 = vmatmul.mubr.msk.bf16.vlgmr.msra.gmra.mrb[0].mxu0 %vm124_vm0, %v1808_v23 }
  0x4a   :  { %1378 = vmatprep.mubr.msk.bf16.mxu0 %vm124_vm0, %v1810_v24 }
  0x51   :  { %1379 = vmatmul.mubr.msk.bf16.gmra.mrb[4].mxu0 %vm124_vm0, %v1816_v27 }
  0x52   :  { %1426 = vmatprep.mubr.msk.bf16.mxu0 %vm124_vm0, %v102_v11  ;;  %v442_v11 = vld [vmem:[%s2300_s7 + $0x28] sm:$0xff] }
  0x53   :  { %v455_v12 = vpack.c.bf16 %v442_v11, %v441_v10 }
 0x11c   :  { %v1376_v31 = vpop.f32.mrb[0].mxu0 }
 0x11d   :  { %v171_v32 = vpop.f32.mrb[1].mxu0 }
 0x11e   :  { %v1377_v33 = vpop.f32.mrb[2].mxu0 }
 0x11f   :  { %v203_v34 = vpack.c.bf16 %v1377_v33, %v1376_v31  ;;  %v174_v35 = vpop.f32.mrb[3].mxu0 }
 0x120   :  { %v202_v36 = vpack.c.bf16 %v174_v35, %v171_v32 }
 0x122   :  { %1386 = vmatprep.mubr.msk.bf16.mxu1 %vm213_vm1, %v202_v36 }
 0x123   :  { %1387 = vmatmul.mubr.msk.bf16.vlgmr.msra.gmra.mrb[0].mxu1 %vm213_vm1, %v203_v34 }
 0x124   :  { %v1380_v37 = vpop.f32.mrb[4].mxu0  ;;  %1395 = vmatpush3.bf16.msra.mxu1 %v453_v2 }
 0x125   :  { %v187_v38 = vpop.f32.mrb[5].mxu0  ;;  %1396 = vmatprep.subr.bf16.mxu1 %v454_v7 }
 0x126   :  { %v1381_v39 = vpop.f32.mrb[6].mxu0 }
 0x127   :  { %v205_v40 = vpack.c.bf16 %v1381_v39, %v1380_v37  ;;  %v190_v41 = vpop.f32.mrb[7].mxu0 }
 0x128   :  { %v204_v42 = vpack.c.bf16 %v190_v41, %v187_v38  ;;  %1397 = vmatpush3.bf16.msra.mxu1 %v454_v7 }
 0x129   :  { %1398 = vmatprep.subr.bf16.mxu1 %v455_v12 }
 0x12a   :  { %1390 = vmatprep.mubr.msk.bf16.mxu1 %vm213_vm1, %v204_v42 }
 0x12b   :  { %1391 = vmatmul.mubr.msk.bf16.gmra.mrb[4].mxu1 %vm213_vm1, %v205_v40 }
 0x12c   :  { %1399 = vmatpush3.bf16.msra.mxu1 %v455_v12 }
 0x12d   :  { %1400 = vmatprep.subr.bf16.mxu1 %v456_v15 }
 0x130   :  { %1401 = vmatpush3.bf16.msra.mxu1 %v456_v15 }
 0x131   :  { %1402 = vmatprep.subr.bf16.mxu1 %v457_v18 }
 0x134   :  { %1403 = vmatpush3.bf16.msra.mxu1 %v457_v18 }
 0x135   :  { %1404 = vmatprep.subr.bf16.mxu1 %v458_v21 }
 0x138   :  { %1405 = vmatpush3.bf16.msra.mxu1 %v458_v21 }
 0x139   :  { %1406 = vmatprep.subr.bf16.mxu1 %v459_v26 }
 0x13c   :  { %1407 = vmatpush3.bf16.msra.mxu1 %v459_v26 }
 0x13d   :  { %1408 = vmatprep.subr.bf16.mxu1 %v460_v30 }
 0x140   :  { %1409 = vmatpush3.bf16.msra.mxu1 %v460_v30 }
 0x1f6   :  { %v1388_v44 = vpop.f32.mrb[0].mxu1 }
 0x1f7   :  { %v1830_v45 = vadd.f32 %v1388_v44, %v1277_v43  ;;  %v260_v46 = vpop.f32.mrb[1].mxu1 }
 0x1f8   :  { %v1832_v47 = vadd.f32 %v1277_v43, %v260_v46  ;;  %v1389_v48 = vpop.f32.mrb[2].mxu1 }
 0x1f9   :  { %295 = vadd.xlane.f32.xlu1 %v1830_v45  ;;  %v263_v49 = vpop.f32.mrb[3].mxu1  ;;  %v1836_v50 = vadd.f32 %v1389_v48, %v1277_v43  ;;  %v309_v51 = vmul.f32 %v1830_v45, %v1830_v45 }
 0x1fa   :  { %291 = vadd.xlane.f32.xlu0 %v1832_v47  ;;  %v1841_v53 = vadd.f32 %v1277_v43, %v263_v49  ;;  %v307_v59 = vmul.f32 %v1832_v47, %v1832_v47 }
 0x1fb   :  { %v310_v55 = vmul.f32 %v1836_v50, %v1836_v50 }
 0x1fc   :  { %v308_v58 = vmul.f32 %v1841_v53, %v1841_v53 }
 0x1fd   :  { %297 = vadd.xlane.f32.xlu1 %v1836_v50 }
 0x1fe   :  { %319 = vadd.xlane.f32.xlu0 %v309_v51  ;;  %v1392_v52 = vpop.f32.mrb[4].mxu1 }
 0x1ff   :  { %v276_v54 = vpop.f32.mrb[5].mxu1  ;;  %v1852_v61 = vadd.f32 %v1392_v52, %v1277_v43 }
 0x200   :  { %v1393_v56 = vpop.f32.mrb[6].mxu1  ;;  %v1858_v63 = vadd.f32 %v1277_v43, %v276_v54 }
 0x201   :  { %321 = vadd.xlane.f32.xlu1 %v310_v55  ;;  %v279_v57 = vpop.f32.mrb[7].mxu1  ;;  %v1850_v60 = vadd.f32 %v1393_v56, %v1277_v43  ;;  %v313_v9 = vmul.f32 %v1852_v61, %v1852_v61 }
 0x202   :  { %293 = vadd.xlane.f32.xlu0 %v1841_v53  ;;  %v1856_v62 = vadd.f32 %v1277_v43, %v279_v57  ;;  %v311_v4 = vmul.f32 %v1858_v63, %v1858_v63 }
 0x203   :  { %v314_v8 = vmul.f32 %v1850_v60, %v1850_v60 }
 0x204   :  { %v312_v3 = vmul.f32 %v1856_v62, %v1856_v62 }
 0x205   :  { %317 = vadd.xlane.f32.xlu1 %v308_v58 }
 0x206   :  { %315 = vadd.xlane.f32.xlu0 %v307_v59 }
 0x209   :  { %305 = vadd.xlane.f32.xlu1 %v1850_v60 }
 0x20a   :  { %303 = vadd.xlane.f32.xlu0 %v1852_v61 }
 0x20d   :  { %301 = vadd.xlane.f32.xlu1 %v1856_v62 }
 0x20e   :  { %299 = vadd.xlane.f32.xlu0 %v1858_v63 }
 0x211   :  { %325 = vadd.xlane.f32.xlu1 %v312_v3 }
 0x212   :  { %323 = vadd.xlane.f32.xlu0 %v311_v4 }
 0x215   :  { %329 = vadd.xlane.f32.xlu1 %v314_v8 }
 0x216   :  { %327 = vadd.xlane.f32.xlu0 %v313_v9 }
 0x286   :  { %v296_v31 = vpop.xlane.xlu1 %295 }
 0x287   :  { %v292_v32 = vpop.xlane.xlu0 %291  ;;  %v333_v33 = vmul.f32 0.0078125, %v296_v31 }
 0x288   :  { %v331_v44 = vmul.f32 0.0078125, %v292_v32 }
 0x289   :  { %v349_v37 = vmul.f32 %v333_v33, %v333_v33  ;;  %v365_v10 = vsub.f32 %v1830_v45, %v333_v33 }
 0x28a   :  { %v298_v34 = vpop.xlane.xlu1 %297  ;;  %v347_v57 = vmul.f32 %v331_v44, %v331_v44  ;;  %v363_v25 = vsub.f32 %v1832_v47, %v331_v44 }
 0x28b   :  { %v334_v35 = vmul.f32 0.0078125, %v298_v34  ;;  %v320_v36 = vpop.xlane.xlu0 %319 }
 0x28c   :  { %v341_v38 = vmul.f32 0.0078125, %v320_v36 }
 0x28d   :  { %v350_v41 = vmul.f32 %v334_v35, %v334_v35  ;;  %v366_v11 = vsub.f32 %v1836_v50, %v334_v35  ;;  %v1282_v50 = vld [vmem:[%s2298_s5] ss:$0 sm:$0xff] }
 0x28e   :  { %v357_v39 = vsub.f32 %v341_v38, %v349_v37  ;;  %v322_v40 = vpop.xlane.xlu1 %321 }
 0x28f   :  { %v342_v42 = vmul.f32 0.0078125, %v322_v40  ;;  %v294_v43 = vpop.xlane.xlu0 %293 }
 0x290   :  { %v373_v46 = vadd.f32 1e-05, %v357_v39  ;;  %v332_v48 = vmul.f32 0.0078125, %v294_v43 }
 0x291   :  { %v358_v49 = vsub.f32 %v342_v42, %v350_v41  ;;  %v1283_v42 = vld [vmem:[%s2299_s6] ss:$0 sm:$0xff] }
 0x292   :  { %v348_v51 = vmul.f32 %v332_v48, %v332_v48  ;;  %v318_v52 = vpop.xlane.xlu1 %317  ;;  %1520 = vrsqrt.f32 %v373_v46  ;;  %v364_v26 = vsub.f32 %v1841_v53, %v332_v48 }
 0x293   :  { %v374_v54 = vadd.f32 1e-05, %v358_v49  ;;  %v340_v55 = vmul.f32 0.0078125, %v318_v52  ;;  %v316_v56 = vpop.xlane.xlu0 %315 }
 0x294   :  { %v339_v58 = vmul.f32 0.0078125, %v316_v56 }
 0x295   :  { %1522 = vrsqrt.f32 %v374_v54  ;;  %v356_v59 = vsub.f32 %v340_v55, %v348_v51 }
 0x296   :  { %v355_v0 = vsub.f32 %v339_v58, %v347_v57  ;;  %v306_v1 = vpop.xlane.xlu1 %305 }
 0x297   :  { %v372_v2 = vadd.f32 1e-05, %v356_v59  ;;  %v304_v3 = vpop.xlane.xlu0 %303  ;;  %v1924_v14 = vmul.f32 0.0078125, %v306_v1 }
 0x298   :  { %v371_v4 = vadd.f32 1e-05, %v355_v0  ;;  %v1926_v15 = vmul.f32 0.0078125, %v304_v3 }
 0x299   :  { %1524 = vrsqrt.f32 %v372_v2  ;;  %v354_v32 = vmul.f32 %v1924_v14, %v1924_v14 }
 0x29a   :  { %1526 = vrsqrt.f32 %v371_v4  ;;  %v302_v5 = vpop.xlane.xlu1 %301  ;;  %v353_v33 = vmul.f32 %v1926_v15, %v1926_v15 }
 0x29b   :  { %v1918_v6 = vmul.f32 0.0078125, %v302_v5  ;;  %v300_v7 = vpop.xlane.xlu0 %299 }
 0x29c   :  { %v1920_v8 = vmul.f32 0.0078125, %v300_v7  ;;  %v1521_v9 = vpop.eup %1520 }
 0x29d   :  { %v352_v16 = vmul.f32 %v1918_v6, %v1918_v6  ;;  %v389_v19 = vmul.f32 %v1521_v9, %v365_v10  ;;  %v368_v1 = vsub.f32 %v1856_v62, %v1918_v6  ;;  %v370_v10 = vsub.f32 %v1850_v60, %v1924_v14 }
 0x29e   :  { %v326_v12 = vpop.xlane.xlu1 %325  ;;  %v351_v21 = vmul.f32 %v1920_v8, %v1920_v8  ;;  %v367_v4 = vsub.f32 %v1858_v63, %v1920_v8 }
 0x29f   :  { %v1523_v13 = vpop.eup %1522  ;;  %v344_v17 = vmul.f32 0.0078125, %v326_v12  ;;  %v324_v18 = vpop.xlane.xlu0 %323  ;;  %v404_v47 = vmul.f32 %v1282_v50, %v389_v19 }
 0x2a0   :  { %v390_v20 = vmul.f32 %v1523_v13, %v366_v11  ;;  %v343_v22 = vmul.f32 0.0078125, %v324_v18  ;;  %v369_v13 = vsub.f32 %v1852_v61, %v1926_v15 }
 0x2a1   :  { %v360_v45 = vsub.f32 %v344_v17, %v352_v16  ;;  %v419_v54 = vadd.f32 %v1283_v42, %v404_v47 }
 0x2a2   :  { %v359_v28 = vsub.f32 %v343_v22, %v351_v21  ;;  %v330_v29 = vpop.xlane.xlu1 %329  ;;  %v405_v30 = vmul.f32 %v1282_v50, %v390_v20 }
 0x2a3   :  { %v1525_v31 = vpop.eup %1524  ;;  %v376_v34 = vadd.f32 1e-05, %v360_v45  ;;  %v346_v35 = vmul.f32 0.0078125, %v330_v29  ;;  %v328_v36 = vpop.xlane.xlu0 %327  ;;  %v427_v59 = vmax.f32 %v419_v54, 0.0 }
 0x2a4   :  { %v1527_v37 = vpop.eup %1526  ;;  %v375_v38 = vadd.f32 1e-05, %v359_v28  ;;  %v345_v39 = vmul.f32 0.0078125, %v328_v36  ;;  %v388_v40 = vmul.f32 %v1525_v31, %v364_v26  ;;  %v420_v46 = vadd.f32 %v1283_v42, %v405_v30 }
 0x2a5   :  { %1528 = vrsqrt.f32 %v376_v34  ;;  %v362_v53 = vsub.f32 %v346_v35, %v354_v32  ;;  %v387_v41 = vmul.f32 %v1527_v37, %v363_v25  ;;  %v1284_v37 = vld [vmem:[%s2301_s8] ss:$0 sm:$0xff] }
 0x2a6   :  { %1530 = vrsqrt.f32 %v375_v38  ;;  %v361_v43 = vsub.f32 %v345_v39, %v353_v33  ;;  %v403_v44 = vmul.f32 %v1282_v50, %v388_v40  ;;  %v428_v57 = vmax.f32 %v420_v46, 0.0 }
 0x2a7   :  { %v378_v48 = vadd.f32 1e-05, %v362_v53  ;;  %v402_v49 = vmul.f32 %v1282_v50, %v387_v41 }
 0x2a8   :  { %v377_v51 = vadd.f32 1e-05, %v361_v43  ;;  %v418_v52 = vadd.f32 %v1283_v42, %v403_v44  ;;  %v434_v2 = vpack.c.bf16 %v428_v57, %v427_v59  ;;  %v748_v57 = vld [vmem:[%s2304_s11] sm:$0xff] }
 0x2a9   :  { %1532 = vrsqrt.f32 %v378_v48  ;;  %v417_v55 = vadd.f32 %v1283_v42, %v402_v49 }
 0x2aa   :  { %1534 = vrsqrt.f32 %v377_v51  ;;  %v426_v56 = vmax.f32 %v418_v52, 0.0 }
 0x2ab   :  { %v425_v58 = vmax.f32 %v417_v55, 0.0 }
 0x2ad   :  { %v433_v0 = vpack.c.bf16 %v426_v56, %v425_v58  ;;  %v749_v58 = vld [vmem:[%s2304_s11 + $0x8] sm:$0xff] }
 0x2af   :  { %v1529_v3 = vpop.eup %1528  ;;  %1410 = vmatprep.mubr.bf16.mxu1 %v433_v0  ;;  %v764_v0 = vpack.c.bf16 %v749_v58, %v748_v57 }
 0x2b0   :  { %v1531_v5 = vpop.eup %1530  ;;  %1411 = vmatmul.mubr.bf16.vlgmr.msra.gmra.mrb[8].mxu1 %v434_v2  ;;  %v392_v7 = vmul.f32 %v1529_v3, %v368_v1  ;;  %v750_v2 = vld [vmem:[%s2304_s11 + $0x10] sm:$0xff]  ;;  %v751_v3 = vld [vmem:[%s2304_s11 + $0x18] sm:$0xff] }
 0x2b1   :  { %v391_v9 = vmul.f32 %v1531_v5, %v367_v4  ;;  %v765_v5 = vpack.c.bf16 %v751_v3, %v750_v2 }
 0x2b2   :  { %v407_v11 = vmul.f32 %v1282_v50, %v392_v7 }
 0x2b3   :  { %v1533_v12 = vpop.eup %1532  ;;  %v406_v16 = vmul.f32 %v1282_v50, %v391_v9  ;;  %v752_v9 = vld [vmem:[%s2304_s11 + $0x20] sm:$0xff] }
 0x2b4   :  { %v1535_v62 = vpop.eup %1534  ;;  %v422_v6 = vadd.f32 %v1283_v42, %v407_v11  ;;  %v394_v17 = vmul.f32 %v1533_v12, %v370_v10  ;;  %v753_v10 = vld [vmem:[%s2304_s11 + $0x28] sm:$0xff]  ;;  %v754_v12 = vld [vmem:[%s2304_s11 + $0x30] sm:$0xff] }
 0x2b5   :  { %v421_v18 = vadd.f32 %v1283_v42, %v406_v16  ;;  %v393_v19 = vmul.f32 %v1535_v62, %v369_v13  ;;  %v766_v11 = vpack.c.bf16 %v753_v10, %v752_v9  ;;  %v755_v13 = vld [vmem:[%s2304_s11 + $0x38] sm:$0xff]  ;;  %v756_v62 = vld [vmem:[%s2304_s11 + $0x40] sm:$0xff] }
 0x2b6   :  { %v430_v63 = vmax.f32 %v422_v6, 0.0  ;;  %v409_v8 = vmul.f32 %v1282_v50, %v394_v17  ;;  %v767_v16 = vpack.c.bf16 %v755_v13, %v754_v12  ;;  %v757_v6 = vld [vmem:[%s2304_s11 + $0x48] sm:$0xff] }
 0x2b7   :  { %v429_v20 = vmax.f32 %v421_v18, 0.0  ;;  %v408_v21 = vmul.f32 %v1282_v50, %v393_v19  ;;  %v768_v17 = vpack.c.bf16 %v757_v6, %v756_v62  ;;  %v758_v18 = vld [vmem:[%s2304_s11 + $0x50] sm:$0xff]  ;;  %v759_v19 = vld [vmem:[%s2304_s11 + $0x58] sm:$0xff] }
 0x2b8   :  { %v424_v22 = vadd.f32 %v1283_v42, %v409_v8  ;;  %v760_v8 = vld [vmem:[%s2304_s11 + $0x60] sm:$0xff] }
 0x2b9   :  { %v435_v45 = vpack.c.bf16 %v430_v63, %v429_v20  ;;  %v423_v25 = vadd.f32 %v1283_v42, %v408_v21  ;;  %v769_v63 = vpack.c.bf16 %v759_v19, %v758_v18  ;;  %v761_v20 = vld [vmem:[%s2304_s11 + $0x68] sm:$0xff]  ;;  %v2072_v19 = vld [vmem:[%s2302_s9] ss:$0 sm:$0xff] }
 0x2ba   :  { %v432_v26 = vmax.f32 %v424_v22, 0.0  ;;  %v770_v21 = vpack.c.bf16 %v761_v20, %v760_v8  ;;  %v762_v22 = vld [vmem:[%s2304_s11 + $0x70] sm:$0xff] }
 0x2bb   :  { %1414 = vmatprep.mubr.bf16.mxu1 %v435_v45  ;;  %v431_v60 = vmax.f32 %v423_v25, 0.0  ;;  %v763_v45 = vld [vmem:[%s2304_s11 + $0x78] sm:$0xff] }
 0x2bc   :  { %v771_v25 = vpack.c.bf16 %v763_v45, %v762_v22 }
 0x2bd   :  { %v436_v14 = vpack.c.bf16 %v432_v26, %v431_v60  ;;  %v1646_v26 = vmov 0.0  }
 0x2be   :  { %1458 = vmatprep.subr.bf16.mxu1 %v1646_v26 }
 0x2bf   :  { %1415 = vmatmul.mubr.bf16.gmra.mrb[12].mxu1 %v436_v14 }
 0x2c0   :  { %1466 = vmatprep.mubr.msk.bf16.mxu1 %vm1648_vm2, %v1646_v26 }
 0x383   :  { %v1412_v28 = vpop.f32.mrb[8].mxu1 }
 0x384   :  { %v495_v61 = vpop.f32.mrb[9].mxu1 }
 0x385   :  { %v1413_v15 = vpop.f32.mrb[10].mxu1 }
 0x386   :  { %v527_v29 = vpack.c.bf16 %v1413_v15, %v1412_v28  ;;  %v498_v30 = vpop.f32.mrb[11].mxu1 }
 0x387   :  { %v526_v31 = vpack.c.bf16 %v498_v30, %v495_v61 }
 0x389   :  { %1418 = vmatprep.subr.bf16.mxu0 %v526_v31 }
 0x38a   :  { %1419 = vmatpush3.bf16.msra.mxu0 %v526_v31 }
 0x38b   :  { %1420 = vmatprep.subr.bf16.mxu0 %v527_v29 }
 0x38e   :  { %1421 = vmatpush3.bf16.msra.mxu0 %v527_v29 }
 0x392   :  { %v1416_v32 = vpop.f32.mrb[12].mxu1 }
 0x393   :  { %v511_v50 = vpop.f32.mrb[13].mxu1 }
 0x394   :  { %v1417_v33 = vpop.f32.mrb[14].mxu1 }
 0x395   :  { %v529_v34 = vpack.c.bf16 %v1417_v33, %v1416_v32  ;;  %v514_v35 = vpop.f32.mrb[15].mxu1 }
 0x396   :  { %v528_v36 = vpack.c.bf16 %v514_v35, %v511_v50 }
 0x398   :  { %1422 = vmatprep.subr.bf16.mxu0 %v528_v36 }
 0x399   :  { %1423 = vmatpush3.bf16.msra.mxu0 %v528_v36 }
 0x39a   :  { %1424 = vmatprep.subr.bf16.mxu0 %v529_v34 }
 0x39d   :  { %1425 = vmatpush3.bf16.msra.mxu0 %v529_v34 }
 0x39e   :  { %1434 = vmatprep.subr.bf16.mxu0 %v764_v0 }
 0x3a0   :  { %1427 = vmatmul.mubr.msk.bf16.vlgmr.msra.gmra.mrb[8].mxu0 %vm124_vm0, %v1808_v23 }
 0x3a1   :  { %1430 = vmatprep.mubr.msk.bf16.mxu0 %vm124_vm0, %v1810_v24  ;;  %1435 = vmatpush3.bf16.msra.mxu0 %v764_v0 }
 0x3a2   :  { %1436 = vmatprep.subr.bf16.mxu0 %v765_v5 }
 0x3a5   :  { %1437 = vmatpush3.bf16.msra.mxu0 %v765_v5 }
 0x3a6   :  { %1438 = vmatprep.subr.bf16.mxu0 %v766_v11 }
 0x3a8   :  { %1431 = vmatmul.mubr.msk.bf16.gmra.mrb[12].mxu0 %vm124_vm0, %v1816_v27 }
 0x3a9   :  { %1439 = vmatpush3.bf16.msra.mxu0 %v766_v11 }
 0x3aa   :  { %1440 = vmatprep.subr.bf16.mxu0 %v767_v16 }
 0x3ad   :  { %1441 = vmatpush3.bf16.msra.mxu0 %v767_v16 }
 0x3ae   :  { %1442 = vmatprep.subr.bf16.mxu0 %v768_v17 }
 0x3b1   :  { %1443 = vmatpush3.bf16.msra.mxu0 %v768_v17 }
 0x3b2   :  { %1444 = vmatprep.subr.bf16.mxu0 %v769_v63 }
 0x3b5   :  { %1445 = vmatpush3.bf16.msra.mxu0 %v769_v63 }
 0x3b6   :  { %1446 = vmatprep.subr.bf16.mxu0 %v770_v21 }
 0x3b9   :  { %1447 = vmatpush3.bf16.msra.mxu0 %v770_v21 }
 0x3ba   :  { %1448 = vmatprep.subr.bf16.mxu0 %v771_v25 }
 0x3bd   :  { %1449 = vmatpush3.bf16.msra.mxu0 %v771_v25 }
 0x3be   :  { %1490 = vmatprep.subr.bf16.mxu0 %v1646_v26 }
 0x473   :  { %v1428_v38 = vpop.f32.mrb[8].mxu0 }
 0x474   :  { %v1961_v39 = vadd.f32 %v1428_v38, %v1284_v37  ;;  %v571_v40 = vpop.f32.mrb[9].mxu0 }
 0x475   :  { %v1429_v47 = vpop.f32.mrb[10].mxu0  ;;  %v1966_v41 = vadd.f32 %v1284_v37, %v571_v40 }
 0x476   :  { %v1963_v53 = vadd.f32 %v1429_v47, %v1284_v37  ;;  %606 = vadd.xlane.f32.xlu0 %v1961_v39  ;;  %v574_v23 = vpop.f32.mrb[11].mxu0  ;;  %v620_v42 = vmul.f32 %v1961_v39, %v1961_v39 }
 0x477   :  { %v1969_v24 = vadd.f32 %v1284_v37, %v574_v23  ;;  %v618_v49 = vmul.f32 %v1966_v41, %v1966_v41 }
 0x478   :  { %608 = vadd.xlane.f32.xlu1 %v1963_v53  ;;  %v621_v46 = vmul.f32 %v1963_v53, %v1963_v53 }
 0x479   :  { %v619_v52 = vmul.f32 %v1969_v24, %v1969_v24 }
 0x47a   :  { %602 = vadd.xlane.f32.xlu0 %v1966_v41 }
 0x47b   :  { %v1432_v27 = vpop.f32.mrb[12].mxu0 }
 0x47c   :  { %604 = vadd.xlane.f32.xlu1 %v1969_v24  ;;  %v587_v43 = vpop.f32.mrb[13].mxu0  ;;  %v1979_v51 = vadd.f32 %v1432_v27, %v1284_v37 }
 0x47d   :  { %v1433_v44 = vpop.f32.mrb[14].mxu0  ;;  %v1986_v55 = vadd.f32 %v1284_v37, %v587_v43 }
 0x47e   :  { %630 = vadd.xlane.f32.xlu0 %v620_v42  ;;  %v590_v48 = vpop.f32.mrb[15].mxu0  ;;  %v1983_v54 = vadd.f32 %v1433_v44, %v1284_v37  ;;  %v624_v4 = vmul.f32 %v1979_v51, %v1979_v51 }
 0x47f   :  { %v1989_v56 = vadd.f32 %v1284_v37, %v590_v48  ;;  %v622_v59 = vmul.f32 %v1986_v55, %v1986_v55 }
 0x480   :  { %632 = vadd.xlane.f32.xlu1 %v621_v46  ;;  %v625_v7 = vmul.f32 %v1983_v54, %v1983_v54 }
 0x481   :  { %v623_v1 = vmul.f32 %v1989_v56, %v1989_v56 }
 0x482   :  { %626 = vadd.xlane.f32.xlu0 %v618_v49 }
 0x484   :  { %628 = vadd.xlane.f32.xlu1 %v619_v52 }
 0x486   :  { %614 = vadd.xlane.f32.xlu0 %v1979_v51 }
 0x488   :  { %616 = vadd.xlane.f32.xlu1 %v1983_v54 }
 0x48a   :  { %610 = vadd.xlane.f32.xlu0 %v1986_v55 }
 0x48c   :  { %612 = vadd.xlane.f32.xlu1 %v1989_v56 }
 0x48e   :  { %634 = vadd.xlane.f32.xlu0 %v622_v59 }
 0x490   :  { %636 = vadd.xlane.f32.xlu1 %v623_v1 }
 0x492   :  { %638 = vadd.xlane.f32.xlu0 %v624_v4 }
 0x494   :  { %640 = vadd.xlane.f32.xlu1 %v625_v7 }
 0x503   :  { %v607_v60 = vpop.xlane.xlu0 %606 }
 0x504   :  { %v644_v61 = vmul.f32 0.0078125, %v607_v60 }
 0x505   :  { %v609_v14 = vpop.xlane.xlu1 %608 }
 0x506   :  { %v645_v29 = vmul.f32 0.0078125, %v609_v14  ;;  %v660_v31 = vmul.f32 %v644_v61, %v644_v61  ;;  %v676_v4 = vsub.f32 %v1961_v39, %v644_v61 }
 0x507   :  { %v603_v28 = vpop.xlane.xlu0 %602 }
 0x508   :  { %v642_v32 = vmul.f32 0.0078125, %v603_v28  ;;  %v661_v35 = vmul.f32 %v645_v29, %v645_v29  ;;  %v677_v12 = vsub.f32 %v1963_v53, %v645_v29 }
 0x509   :  { %v605_v15 = vpop.xlane.xlu1 %604 }
 0x50a   :  { %v2051_v33 = vmul.f32 0.0078125, %v605_v15  ;;  %v658_v40 = vmul.f32 %v642_v32, %v642_v32  ;;  %v674_v63 = vsub.f32 %v1966_v41, %v642_v32 }
 0x50b   :  { %v631_v30 = vpop.xlane.xlu0 %630 }
 0x50c   :  { %v652_v50 = vmul.f32 0.0078125, %v631_v30  ;;  %v659_v42 = vmul.f32 %v2051_v33, %v2051_v33  ;;  %v675_v53 = vsub.f32 %v1969_v24, %v2051_v33  ;;  %v1290_v33 = vld [vmem:[%s2303_s10] ss:$0 sm:$0xff] }
 0x50d   :  { %v633_v34 = vpop.xlane.xlu1 %632 }
 0x50e   :  { %v668_v36 = vsub.f32 %v652_v50, %v660_v31  ;;  %v653_v37 = vmul.f32 0.0078125, %v633_v34 }
 0x50f   :  { %v627_v38 = vpop.xlane.xlu0 %626 }
 0x510   :  { %v684_v47 = vadd.f32 1e-05, %v668_v36  ;;  %v669_v23 = vsub.f32 %v653_v37, %v661_v35  ;;  %v650_v27 = vmul.f32 0.0078125, %v627_v38 }
 0x511   :  { %v629_v43 = vpop.xlane.xlu1 %628 }
 0x512   :  { %1536 = vrsqrt.f32 %v684_v47  ;;  %v685_v44 = vadd.f32 1e-05, %v669_v23  ;;  %v666_v46 = vsub.f32 %v650_v27, %v658_v40  ;;  %v651_v48 = vmul.f32 0.0078125, %v629_v43 }
 0x513   :  { %v615_v49 = vpop.xlane.xlu0 %614 }
 0x514   :  { %1538 = vrsqrt.f32 %v685_v44  ;;  %v682_v52 = vadd.f32 1e-05, %v666_v46  ;;  %v667_v57 = vsub.f32 %v651_v48, %v659_v42  ;;  %v2060_v9 = vmul.f32 0.0078125, %v615_v49 }
 0x515   :  { %v617_v58 = vpop.xlane.xlu1 %616 }
 0x516   :  { %1540 = vrsqrt.f32 %v682_v52  ;;  %v683_v59 = vadd.f32 1e-05, %v667_v57  ;;  %v2065_v16 = vmul.f32 0.0078125, %v617_v58  ;;  %v664_v22 = vmul.f32 %v2060_v9, %v2060_v9 }
 0x517   :  { %v611_v0 = vpop.xlane.xlu0 %610 }
 0x518   :  { %1542 = vrsqrt.f32 %v683_v59  ;;  %v2055_v1 = vmul.f32 0.0078125, %v611_v0  ;;  %v665_v14 = vmul.f32 %v2065_v16, %v2065_v16  ;;  %v680_v0 = vsub.f32 %v1979_v51, %v2060_v9 }
 0x519   :  { %v613_v2 = vpop.xlane.xlu1 %612 }
 0x51a   :  { %v2057_v3 = vmul.f32 0.0078125, %v613_v2  ;;  %v662_v10 = vmul.f32 %v2055_v1, %v2055_v1  ;;  %v678_v46 = vsub.f32 %v1986_v55, %v2055_v1  ;;  %v681_v1 = vsub.f32 %v1983_v54, %v2065_v16 }
 0x51b   :  { %v635_v5 = vpop.xlane.xlu0 %634 }
 0x51c   :  { %v1537_v7 = vpop.eup %1536  ;;  %v654_v11 = vmul.f32 0.0078125, %v635_v5  ;;  %v663_v17 = vmul.f32 %v2057_v3, %v2057_v3  ;;  %v679_v57 = vsub.f32 %v1989_v56, %v2057_v3 }
 0x51d   :  { %v700_v13 = vmul.f32 %v1537_v7, %v676_v4  ;;  %v637_v62 = vpop.xlane.xlu1 %636 }
 0x51e   :  { %v1539_v6 = vpop.eup %1538  ;;  %v670_v18 = vsub.f32 %v654_v11, %v662_v10  ;;  %v655_v39 = vmul.f32 0.0078125, %v637_v62 }
 0x51f   :  { %v701_v8 = vmul.f32 %v1539_v6, %v677_v12  ;;  %v639_v20 = vpop.xlane.xlu0 %638  ;;  %v715_v15 = vmul.f32 %v2072_v19, %v700_v13 }
 0x520   :  { %v1541_v21 = vpop.eup %1540  ;;  %v686_v45 = vadd.f32 1e-05, %v670_v18  ;;  %v671_v25 = vsub.f32 %v655_v39, %v663_v17  ;;  %v656_v60 = vmul.f32 0.0078125, %v639_v20  ;;  %v1291_v39 = vld [vmem:[%s2305_s12] ss:$0 sm:$0xff] }
 0x521   :  { %v641_v28 = vpop.xlane.xlu1 %640  ;;  %v698_v61 = vmul.f32 %v1541_v21, %v674_v63  ;;  %v716_v41 = vmul.f32 %v2072_v19, %v701_v8  ;;  %v730_v47 = vadd.f32 %v1290_v33, %v715_v15  ;;  %v1292_v21 = vld [vmem:[%s2306_s13] ss:$0 sm:$0xff] }
 0x522   :  { %v1543_v29 = vpop.eup %1542  ;;  %1544 = vrsqrt.f32 %v686_v45  ;;  %v687_v24 = vadd.f32 1e-05, %v671_v25  ;;  %v672_v30 = vsub.f32 %v656_v60, %v664_v22  ;;  %v657_v31 = vmul.f32 0.0078125, %v641_v28 }
 0x523   :  { %v699_v32 = vmul.f32 %v1543_v29, %v675_v53  ;;  %v713_v50 = vmul.f32 %v2072_v19, %v698_v61  ;;  %v731_v36 = vadd.f32 %v1290_v33, %v716_v41  ;;  %v738_v44 = vmax.f32 %v730_v47, 0.0 }
 0x524   :  { %1546 = vrsqrt.f32 %v687_v24  ;;  %v688_v34 = vadd.f32 1e-05, %v672_v30  ;;  %v673_v35 = vsub.f32 %v657_v31, %v665_v14 }
 0x525   :  { %v714_v37 = vmul.f32 %v2072_v19, %v699_v32  ;;  %v728_v38 = vadd.f32 %v1290_v33, %v713_v50  ;;  %v739_v27 = vmax.f32 %v731_v36, 0.0 }
 0x526   :  { %1548 = vrsqrt.f32 %v688_v34  ;;  %v689_v40 = vadd.f32 1e-05, %v673_v35 }
 0x527   :  { %v729_v23 = vadd.f32 %v1290_v33, %v714_v37  ;;  %v736_v42 = vmax.f32 %v728_v38, 0.0  ;;  %v745_v52 = vpack.c.bf16 %v739_v27, %v738_v44 }
 0x528   :  { %1550 = vrsqrt.f32 %v689_v40 }
 0x529   :  { %v737_v43 = vmax.f32 %v729_v23, 0.0  ;;  %v1647_v23 = vmov 0  }
 0x52a   :  { %1519 = vset.pattern.permute.xlu1 %v1647_v23  ;;  %1518 = vset.pattern.permute.xlu0 %v1647_v23 }
 0x52b   :  { %v744_v48 = vpack.c.bf16 %v737_v43, %v736_v42 }
 0x52c   :  { %v1545_v49 = vpop.eup %1544 }
 0x52d   :  { %1450 = vmatprep.mubr.bf16.mxu0 %v744_v48  ;;  %1459 = vmatpush3.bf16.msra.mxu1 %v744_v48  ;;  %v702_v58 = vmul.f32 %v1545_v49, %v678_v46  ;;  %v1293_v46 = vld [vmem:[#allocation2] ss:$0 sm:$0xff] }
 0x52e   :  { %v1547_v59 = vpop.eup %1546  ;;  %1451 = vmatmul.mubr.bf16.vlgmr.msra.gmra.mrb[16].mxu0 %v745_v52  ;;  %1460 = vmatprep.subr.bf16.mxu1 %v1646_v26 }
 0x52f   :  { %v703_v2 = vmul.f32 %v1547_v59, %v679_v57  ;;  %v717_v4 = vmul.f32 %v2072_v19, %v702_v58 }
 0x530   :  { %v1549_v55 = vpop.eup %1548 }
 0x531   :  { %1461 = vmatpush3.bf16.msra.mxu1 %v745_v52  ;;  %v718_v56 = vmul.f32 %v2072_v19, %v703_v2  ;;  %v732_v3 = vadd.f32 %v1290_v33, %v717_v4  ;;  %v704_v5 = vmul.f32 %v1549_v55, %v680_v0 }
 0x532   :  { %v1551_v7 = vpop.eup %1550  ;;  %1462 = vmatprep.subr.bf16.mxu1 %v1646_v26 }
 0x533   :  { %v733_v10 = vadd.f32 %v1290_v33, %v718_v56  ;;  %v705_v11 = vmul.f32 %v1551_v7, %v681_v1  ;;  %v719_v12 = vmul.f32 %v2072_v19, %v704_v5  ;;  %v740_v51 = vmax.f32 %v732_v3, 0.0 }
 0x535   :  { %v741_v9 = vmax.f32 %v733_v10, 0.0  ;;  %v720_v13 = vmul.f32 %v2072_v19, %v705_v11  ;;  %v734_v62 = vadd.f32 %v1290_v33, %v719_v12 }
 0x537   :  { %v746_v6 = vpack.c.bf16 %v741_v9, %v740_v51  ;;  %v735_v17 = vadd.f32 %v1290_v33, %v720_v13  ;;  %v742_v54 = vmax.f32 %v734_v62, 0.0  ;;  %v2117_v13 = vld [vmem:[%s2324_s24 + $0x8] sm:$0xff]  ;;  %v2122_v62 = vld [vmem:[%s2324_s24 + $0x30] sm:$0xff] }
 0x538   :  { %vm907_vm3 = vcmp.gt.f32.partialorder %v2117_v13, 0.0  ;;  %vm912_vm4 = vcmp.gt.f32.partialorder %v2122_v62, 0.0 }
 0x539   :  { %1454 = vmatprep.mubr.bf16.mxu0 %v746_v6  ;;  %1463 = vmatpush3.bf16.msra.mxu1 %v746_v6  ;;  %v743_v16 = vmax.f32 %v735_v17, 0.0  ;;  %v2127_v6 = vld [vmem:[%s2324_s24 + $0x20] sm:$0xff]  ;;  %v2132_v17 = vld [vmem:[%s2324_s24 + $0x28] sm:$0xff] }
 0x53a   :  { %1464 = vmatprep.subr.bf16.mxu1 %v1646_v26  ;;  %vm910_vm5 = vcmp.gt.f32.partialorder %v2127_v6, 0.0  ;;  %vm911_vm6 = vcmp.gt.f32.partialorder %v2132_v17, 0.0 }
 0x53b   :  { %v747_v18 = vpack.c.bf16 %v743_v16, %v742_v54  ;;  %v2137_v16 = vld [vmem:[%s2324_s24 + $0x10] sm:$0xff] }
 0x53c   :  { %vm908_vm8 = vcmp.gt.f32.partialorder %v2137_v16, 0.0 }
 0x53d   :  { %1455 = vmatmul.mubr.bf16.gmra.mrb[20].mxu0 %v747_v18  ;;  %1465 = vmatpush3.bf16.msra.mxu1 %v747_v18  ;;  %v2142_v18 = vld [vmem:[%s2324_s24 + $0x18] sm:$0xff] }
 0x53e   :  { %1470 = vmatprep.subr.bf16.mxu1 %v1646_v26  ;;  %1506 = vmatprep.mubr.msk.bf16.mxu0 %vm1648_vm2, %v1646_v26  ;;  %vm909_vm9 = vcmp.gt.f32.partialorder %v2142_v18, 0.0 }
 0x601   :  { %v1452_v63 = vpop.f32.mrb[16].mxu0 }
 0x602   :  { %v822_v19 = vadd.f32 %v1452_v63, %v1291_v39  ;;  %v813_v53 = vpop.f32.mrb[17].mxu0  ;;  %v2156_v63 = vld [vmem:[%s2324_s24 + $0x38] sm:$0xff] }
 0x603   :  { %v814_v8 = vadd.f32 %v1291_v39, %v813_v53  ;;  %v1453_v20 = vpop.f32.mrb[18].mxu0  ;;  %vm913_vm11 = vcmp.gt.f32.partialorder %v2156_v63, 0.0 }
 0x604   :  { %v846_v22 = vmax.f32 %v822_v19, 0.0  ;;  %v825_v45 = vadd.f32 %v1453_v20, %v1291_v39  ;;  %v816_v25 = vpop.f32.mrb[19].mxu0 }
 0x605   :  { %v817_v60 = vadd.f32 %v1291_v39, %v816_v25  ;;  %v844_v14 = vmax.f32 %v814_v8, 0.0 }
 0x606   :  { %v847_v28 = vmax.f32 %v825_v45, 0.0  ;;  %v861_v61 = vmul.f32 %v1292_v21, %v846_v22 }
 0x607   :  { %v845_v15 = vmax.f32 %v817_v60, 0.0  ;;  %v859_v29 = vmul.f32 %v1292_v21, %v844_v14 }
 0x608   :  { %871 = vadd.xlane.f32.xlu0 %v861_v61  ;;  %v862_v41 = vmul.f32 %v1292_v21, %v847_v28 }
 0x609   :  { %v860_v24 = vmul.f32 %v1292_v21, %v845_v15 }
 0x60a   :  { %873 = vadd.xlane.f32.xlu1 %v862_v41 }
 0x60c   :  { %867 = vadd.xlane.f32.xlu0 %v859_v29 }
 0x60e   :  { %869 = vadd.xlane.f32.xlu1 %v860_v24 }
 0x610   :  { %v1456_v30 = vpop.f32.mrb[20].mxu0 }
 0x611   :  { %v829_v31 = vpop.f32.mrb[21].mxu0  ;;  %v838_v32 = vadd.f32 %v1456_v30, %v1291_v39 }
 0x612   :  { %v830_v50 = vadd.f32 %v1291_v39, %v829_v31  ;;  %v1457_v33 = vpop.f32.mrb[22].mxu0 }
 0x613   :  { %v832_v34 = vpop.f32.mrb[23].mxu0  ;;  %v841_v36 = vadd.f32 %v1457_v33, %v1291_v39  ;;  %v850_v38 = vmax.f32 %v838_v32, 0.0 }
 0x614   :  { %v848_v35 = vmax.f32 %v830_v50, 0.0  ;;  %v833_v37 = vadd.f32 %v1291_v39, %v832_v34  ;;  %v2147_v39 = vld [vmem:[%s2324_s24] sm:$0xff] }
 0x615   :  { %v851_v27 = vmax.f32 %v841_v36, 0.0  ;;  %v865_v43 = vmul.f32 %v1292_v21, %v850_v38  ;;  %vm906_vm10 = vcmp.gt.f32.partialorder %v2147_v39, 0.0 }
 0x616   :  { %v849_v40 = vmax.f32 %v833_v37, 0.0  ;;  %v863_v47 = vmul.f32 %v1292_v21, %v848_v35 }
 0x617   :  { %v866_v44 = vmul.f32 %v1292_v21, %v851_v27 }
 0x618   :  { %875 = vadd.xlane.f32.xlu0 %v863_v47  ;;  %v864_v42 = vmul.f32 %v1292_v21, %v849_v40 }
 0x61a   :  { %877 = vadd.xlane.f32.xlu1 %v864_v42 }
 0x61c   :  { %879 = vadd.xlane.f32.xlu0 %v865_v43 }
 0x61e   :  { %881 = vadd.xlane.f32.xlu1 %v866_v44 }
 0x695   :  { %v872_v48 = vpop.xlane.xlu0 %871 }
 0x696   :  { %v892_v49 = vadd.f32 %v1293_v46, %v872_v48 }
 0x697   :  { %v874_v52 = vpop.xlane.xlu1 %873 }
 0x698   :  { %926 = vperm.xlu1 %1519, %v892_v49   ;;  %v893_v58 = vadd.f32 %v1293_v46, %v874_v52 }
 0x699   :  { %v868_v57 = vpop.xlane.xlu0 %867 }
 0x69a   :  { %v890_v59 = vadd.f32 %v1293_v46, %v868_v57 }
 0x69b   :  { %v870_v0 = vpop.xlane.xlu1 %869 }
 0x69c   :  { %931 = vperm.xlu1 %1519, %v893_v58   ;;  %916 = vperm.xlu0 %1518, %v890_v59   ;;  %v891_v2 = vadd.f32 %v1293_v46, %v870_v0 }
 0x6a0   :  { %921 = vperm.xlu1 %1519, %v891_v2  }
 0x6a5   :  { %v876_v4 = vpop.xlane.xlu0 %875 }
 0x6a6   :  { %v894_v3 = vadd.f32 %v1293_v46, %v876_v4 }
 0x6a7   :  { %v878_v56 = vpop.xlane.xlu1 %877 }
 0x6a8   :  { %v895_v5 = vadd.f32 %v1293_v46, %v878_v56 }
 0x6a9   :  { %v880_v55 = vpop.xlane.xlu0 %879 }
 0x6aa   :  { %v896_v1 = vadd.f32 %v1293_v46, %v880_v55 }
 0x6ab   :  { %v882_v7 = vpop.xlane.xlu1 %881 }
 0x6ac   :  { %946 = vperm.xlu1 %1519, %v896_v1   ;;  %v897_v10 = vadd.f32 %v1293_v46, %v882_v7 }
 0x6b0   :  { %936 = vperm.xlu1 %1519, %v894_v3  }
 0x6b4   :  { %941 = vperm.xlu1 %1519, %v895_v5  }
 0x6b8   :  { %951 = vperm.xlu1 %1519, %v897_v10  }
 0x717   :  { %v927_v11 = vpop.permute.xlu1 %926 }
 0x718   :  { %v956_v25 = vsel %vm908_vm8, %v927_v11, -1e+30 }
 0x719   :  { %v965_v30 = vsel %vm962_vm7, %v956_v25, -inf }
 0x71b   :  { %v932_v12 = vpop.permute.xlu1 %931  ;;  %v917_v19 = vpop.permute.xlu0 %916 }
 0x71c   :  { %v957_v60 = vsel %vm909_vm9, %v932_v12, -1e+30  ;;  %v954_v14 = vsel %vm906_vm10, %v917_v19, -1e+30 }
 0x71d   :  { %v966_v31 = vsel %vm962_vm7, %v957_v60, -inf  ;;  %v963_v32 = vsel %vm962_vm7, %v954_v14, -inf }
 0x71f   :  { %v922_v51 = vpop.permute.xlu1 %921 }
 0x720   :  { %v955_v53 = vsel %vm907_vm3, %v922_v51, -1e+30 }
 0x721   :  { %v964_v28 = vsel %vm962_vm7, %v955_v53, -inf }
 0x72b   :  { %v947_v9 = vpop.permute.xlu1 %946 }
 0x72c   :  { %v960_v20 = vsel %vm912_vm4, %v947_v9, -1e+30 }
 0x72d   :  { %v971_v61 = vsel %vm962_vm7, %v960_v20, -inf }
 0x72e   :  { %v972_v33 = vmax.f32 %v965_v30, %v971_v61 }
 0x72f   :  { %v937_v54 = vpop.permute.xlu1 %936 }
 0x730   :  { %v958_v21 = vsel %vm910_vm5, %v937_v54, -1e+30 }
 0x731   :  { %v967_v15 = vsel %vm962_vm7, %v958_v21, -inf }
 0x732   :  { %v968_v34 = vmax.f32 %v963_v32, %v967_v15 }
 0x733   :  { %v942_v8 = vpop.permute.xlu1 %941 }
 0x734   :  { %v959_v22 = vsel %vm911_vm6, %v942_v8, -1e+30 }
 0x735   :  { %v969_v45 = vsel %vm962_vm7, %v959_v22, -inf }
 0x736   :  { %v970_v29 = vmax.f32 %v964_v28, %v969_v45 }
 0x737   :  { %v952_v41 = vpop.permute.xlu1 %951 }
 0x738   :  { %v961_v24 = vsel %vm913_vm11, %v952_v41, -1e+30  ;;  %v975_v36 = vmax.f32 %v968_v34, %v970_v29 }
 0x739   :  { %v973_v50 = vsel %vm962_vm7, %v961_v24, -inf }
 0x73a   :  { %v974_v35 = vmax.f32 %v966_v31, %v973_v50 }
 0x73c   :  { %v976_v37 = vmax.f32 %v972_v33, %v974_v35 }
 0x73e   :  { %v977_v38 = vmax.f32 %v975_v36, %v976_v37 }
 0x740   :  { %v978_v40 = vrot.slane %v977_v38, 4 }
 0x742   :  { %v979_v47 = vmax.f32 %v977_v38, %v978_v40 }
 0x744   :  { %v980_v23 = vrot.slane %v979_v47, 2 }
 0x746   :  { %v981_v27 = vmax.f32 %v979_v47, %v980_v23 }
 0x748   :  { %v982_v42 = vrot.slane %v981_v27, 1 }
 0x74a   :  { %v983_v43 = vmax.f32 %v981_v27, %v982_v42 }
 0x74c   :  { %v984_v44 = vsub.f32 %v954_v14, %v983_v43  ;;  %v985_v46 = vsub.f32 %v955_v53, %v983_v43  ;;  %v986_v48 = vsub.f32 %v956_v25, %v983_v43  ;;  %v987_v49 = vsub.f32 %v957_v60, %v983_v43 }
 0x74d   :  { %v988_v52 = vsub.f32 %v958_v21, %v983_v43  ;;  %v989_v57 = vsub.f32 %v959_v22, %v983_v43  ;;  %v990_v2 = vsub.f32 %v960_v20, %v983_v43  ;;  %v991_v1 = vsub.f32 %v961_v24, %v983_v43 }
 0x74e   :  { %v992_v58 = vmul.f32 1.442695, %v984_v44  ;;  %v994_v59 = vmul.f32 1.442695, %v985_v46  ;;  %v996_v0 = vmul.f32 1.442695, %v986_v48 }
 0x74f   :  { %v998_v4 = vmul.f32 1.442695, %v987_v49  ;;  %v1000_v55 = vmul.f32 1.442695, %v988_v52  ;;  %v1002_v56 = vmul.f32 1.442695, %v989_v57 }
 0x750   :  { %1552 = vpow2.f32 %v992_v58  ;;  %v1004_v3 = vmul.f32 1.442695, %v990_v2  ;;  %v1006_v5 = vmul.f32 1.442695, %v991_v1  ;;  %v1111_v52 = vld [vmem:[#allocation6] sm:$0xff]  ;;  %v1112_v57 = vld [vmem:[#allocation6 + $0x8] sm:$0xff] }
 0x751   :  { %1554 = vpow2.f32 %v994_v59  ;;  %v1127_v58 = vpack.c.bf16 %v1112_v57, %v1111_v52  ;;  %v1113_v59 = vld [vmem:[#allocation6 + $0x10] sm:$0xff]  ;;  %v1116_v1 = vld [vmem:[#allocation6 + $0x28] sm:$0xff] }
 0x752   :  { %1556 = vpow2.f32 %v996_v0  ;;  %v1114_v0 = vld [vmem:[#allocation6 + $0x18] sm:$0xff] }
 0x753   :  { %1558 = vpow2.f32 %v998_v4  ;;  %v1128_v4 = vpack.c.bf16 %v1114_v0, %v1113_v59 }
 0x754   :  { %1560 = vpow2.f32 %v1000_v55  ;;  %v1115_v55 = vld [vmem:[#allocation6 + $0x20] sm:$0xff] }
 0x755   :  { %1562 = vpow2.f32 %v1002_v56  ;;  %v1129_v56 = vpack.c.bf16 %v1116_v1, %v1115_v55 }
 0x756   :  { %1564 = vpow2.f32 %v1004_v3  ;;  %v1117_v3 = vld [vmem:[#allocation6 + $0x30] sm:$0xff] }
 0x757   :  { %1566 = vpow2.f32 %v1006_v5  ;;  %v1118_v5 = vld [vmem:[#allocation6 + $0x38] sm:$0xff] }
 0x75a   :  { %v1553_v7 = vpop.eup %1552 }
 0x75b   :  { %v1555_v10 = vpop.eup %1554  ;;  %v1008_v11 = vsel %vm906_vm10, %v1553_v7, 0.0  ;;  %v1130_v7 = vpack.c.bf16 %v1118_v5, %v1117_v3 }
 0x75c   :  { %v1557_v12 = vpop.eup %1556  ;;  %v1009_v51 = vsel %vm907_vm3, %v1555_v10, 0.0  ;;  %v1016_v9 = vsel %vm962_vm7, %v1008_v11, 0.0  ;;  %v1119_v10 = vld [vmem:[#allocation6 + $0x40] sm:$0xff] }
 0x75d   :  { %v1559_v54 = vpop.eup %1558  ;;  %v1010_v19 = vsel %vm908_vm8, %v1557_v12, 0.0  ;;  %v1017_v53 = vsel %vm962_vm7, %v1009_v51, 0.0 }
 0x75e   :  { %v1561_v8 = vpop.eup %1560  ;;  %v1011_v20 = vsel %vm909_vm9, %v1559_v54, 0.0  ;;  %v1018_v21 = vadd.f32 %v1017_v53, %v1016_v9  ;;  %v1019_v39 = vsel %vm962_vm7, %v1010_v19, 0.0  ;;  %v1122_v9 = vld [vmem:[#allocation6 + $0x58] sm:$0xff]  ;;  %v1124_v53 = vld [vmem:[#allocation6 + $0x68] sm:$0xff] }
 0x75f   :  { %v1563_v22 = vpop.eup %1562  ;;  %v1012_v13 = vsel %vm910_vm5, %v1561_v8, 0.0  ;;  %v1021_v60 = vsel %vm962_vm7, %v1011_v20, 0.0 }
 0x760   :  { %v1020_v45 = vadd.f32 %v1019_v39, %v1018_v21  ;;  %v1565_v25 = vpop.eup %1564  ;;  %v1013_v16 = vsel %vm911_vm6, %v1563_v22, 0.0  ;;  %v1023_v61 = vsel %vm962_vm7, %v1012_v13, 0.0  ;;  %v1126_v21 = vld [vmem:[#allocation6 + $0x78] sm:$0xff] }
 0x761   :  { %v1567_v28 = vpop.eup %1566  ;;  %v1014_v18 = vsel %vm912_vm4, %v1565_v25, 0.0  ;;  %v1025_v41 = vsel %vm962_vm7, %v1013_v16, 0.0  ;;  %v1184_v39 = vld [vmem:[%s2310_s17] sm:$0xff] }
 0x762   :  { %v1022_v14 = vadd.f32 %v1021_v60, %v1020_v45  ;;  %v1015_v6 = vsel %vm913_vm11, %v1567_v28, 0.0  ;;  %v1027_v24 = vsel %vm962_vm7, %v1014_v18, 0.0  ;;  %v1186_v45 = vld [vmem:[%s2310_s17 + $0x10] sm:$0xff]  ;;  %v1187_v60 = vld [vmem:[%s2310_s17 + $0x18] sm:$0xff]  ;;  %v1189_v28 = vld [vmem:[%s2310_s17 + $0x28] sm:$0xff] }
 0x763   :  { %v1029_v17 = vsel %vm962_vm7, %v1015_v6, 0.0 }
 0x764   :  { %v1024_v15 = vadd.f32 %v1023_v61, %v1022_v14  ;;  %v1188_v14 = vld [vmem:[%s2310_s17 + $0x20] sm:$0xff] }
 0x765   :  { %v1202_v61 = vpack.c.bf16 %v1189_v28, %v1188_v14 }
 0x766   :  { %v1026_v29 = vadd.f32 %v1025_v41, %v1024_v15  ;;  %v1191_v15 = vld [vmem:[%s2310_s17 + $0x38] sm:$0xff] }
 0x768   :  { %v1028_v30 = vadd.f32 %v1027_v24, %v1026_v29  ;;  %v1193_v29 = vld [vmem:[%s2310_s17 + $0x48] sm:$0xff] }
 0x76a   :  { %v1030_v31 = vadd.f32 %v1029_v17, %v1028_v30  ;;  %v1194_v30 = vld [vmem:[%s2310_s17 + $0x50] sm:$0xff]  ;;  %v1195_v17 = vld [vmem:[%s2310_s17 + $0x58] sm:$0xff] }
 0x76c   :  { %v1031_v32 = vrot.slane %v1030_v31, 4 }
 0x76e   :  { %v1032_v50 = vadd.f32 %v1031_v32, %v1030_v31  ;;  %v1205_v31 = vpack.c.bf16 %v1195_v17, %v1194_v30 }
 0x770   :  { %v1033_v33 = vrot.slane %v1032_v50, 2 }
 0x772   :  { %v1034_v34 = vadd.f32 %v1033_v33, %v1032_v50 }
 0x774   :  { %v1035_v35 = vrot.slane %v1034_v34, 1 }
 0x776   :  { %v1036_v62 = vadd.f32 %v1035_v35, %v1034_v34 }
 0x778   :  { %v1037_v36 = vmax.f32 %v1036_v62, 1e-30  ;;  %v1196_v62 = vld [vmem:[%s2310_s17 + $0x60] sm:$0xff] }
 0x77a   :  { %1568 = vrcp.f32 %v1037_v36  ;;  %v1197_v36 = vld [vmem:[%s2310_s17 + $0x68] sm:$0xff] }
 0x784   :  { %v1569_v37 = vpop.eup %1568 }
 0x785   :  { %v1039_v38 = vmul.f32 %v1569_v37, %v1008_v11  ;;  %v1040_v40 = vmul.f32 %v1569_v37, %v1009_v51  ;;  %v1041_v47 = vmul.f32 %v1569_v37, %v1010_v19  ;;  %v1042_v23 = vmul.f32 %v1569_v37, %v1011_v20  ;;  %v1120_v11 = vld [vmem:[#allocation6 + $0x48] sm:$0xff]  ;;  %v1121_v51 = vld [vmem:[#allocation6 + $0x50] sm:$0xff]  ;;  %v1123_v19 = vld [vmem:[#allocation6 + $0x60] sm:$0xff] }
 0x786   :  { %v1043_v42 = vmul.f32 %v1569_v37, %v1012_v13  ;;  %v1044_v43 = vmul.f32 %v1569_v37, %v1013_v16  ;;  %v1045_v44 = vmul.f32 %v1569_v37, %v1014_v18  ;;  %v1046_v46 = vmul.f32 %v1569_v37, %v1015_v6  ;;  %v1125_v20 = vld [vmem:[#allocation6 + $0x70] sm:$0xff]  ;;  %v1185_v13 = vld [vmem:[%s2310_s17 + $0x8] sm:$0xff]  ;;  %v1192_v6 = vld [vmem:[%s2310_s17 + $0x40] sm:$0xff] }
 0x787   :  { %v1047_v63 = vpack.c.bf16 %v1040_v40, %v1039_v38  ;;  %v1048_v27 = vpack.c.bf16 %v1042_v23, %v1041_v47  ;;  %v1131_v12 = vpack.c.bf16 %v1120_v11, %v1119_v10  ;;  %v1132_v54 = vpack.c.bf16 %v1122_v9, %v1121_v51  ;;  %v1190_v18 = vld [vmem:[%s2310_s17 + $0x30] sm:$0xff]  ;;  %v1199_v40 = vld [vmem:[%s2310_s17 + $0x78] sm:$0xff]  ;;  %v1295_v47 = vld [vmem:[%s2309_s16] ss:$0 sm:$0xff] }
 0x788   :  { %v1049_v48 = vpack.c.bf16 %v1044_v43, %v1043_v42  ;;  %v1050_v49 = vpack.c.bf16 %v1046_v46, %v1045_v44  ;;  %v1133_v8 = vpack.c.bf16 %v1124_v53, %v1123_v19  ;;  %v1134_v22 = vpack.c.bf16 %v1126_v21, %v1125_v20  ;;  %v1198_v38 = vld [vmem:[%s2310_s17 + $0x70] sm:$0xff]  ;;  %s1649_s17 = smov [#allocation8]  }
 0x789   :  { %1051 = vxpose.xlu1.c.b16.start [1/4] (short) (narrow) %v1047_v63, 16  ;;  %v1200_v25 = vpack.c.bf16 %v1185_v13, %v1184_v39  ;;  %v1201_v16 = vpack.c.bf16 %v1187_v60, %v1186_v45  ;;  %v1203_v41 = vpack.c.bf16 %v1191_v15, %v1190_v18  ;;  %v1204_v24 = vpack.c.bf16 %v1193_v29, %v1192_v6  ;;  %s1263_s30 = sshll.u32 %s1649_s17, 4  ;;  %s1264_s30 = int_to_ptr.vmem [resolvable:$true] %s1263_s30 }
 0x78a   :  { %v1206_v37 = vpack.c.bf16 %v1197_v36, %v1196_v62  ;;  %v1207_v63 = vpack.c.bf16 %v1199_v40, %v1198_v38  ;;  %s1614_s16 = scalar_lea.vmem %s1264_s30, 32  ;;  %p1619_p3 = scmp.lt.s32.totalorder %s1264_s30, %s1264_s30 }
 0x78b   :  { %1491 = vmatpush3.bf16.msra.mxu0 %v1200_v25  ;;  %p1615_p2 = scmp.ne.s32.totalorder %s1264_s30, %s1614_s16  ;;  %p1620_p4 = scmp.lt.s32.totalorder %s1614_s16, %s1614_s16 }
 0x78c   :  { %1492 = vmatprep.subr.bf16.mxu0 %v1646_v26 }
 0x78d   :  { %1052 = vxpose.xlu1.c.b16.cont [2/4] (short) (narrow) %v1048_v27, 16  ;;  %p1621_p5 = por %p1620_p4, %p1619_p3 }
 0x78f   :  { %1493 = vmatpush3.bf16.msra.mxu0 %v1201_v16  ;;  %p1622_p6 = pnand %p1621_p5, %p1615_p2 }
 0x790   :  { %1494 = vmatprep.subr.bf16.mxu0 %v1646_v26 }
 0x791   :  { %1053 = vxpose.xlu1.c.b16.cont [3/4] (short) (narrow) %v1049_v48, 16 }
 0x793   :  { %1495 = vmatpush3.bf16.msra.mxu0 %v1202_v61 }
 0x794   :  { %1496 = vmatprep.subr.bf16.mxu0 %v1646_v26 }
 0x795   :  { %1054 = vxpose.xlu1.c.b16.end [4/4] (short) (narrow) %v1050_v49, 16  ;;  %v1296_v49 = vld [vmem:[%s2311_s18] ss:$0 sm:$0xff] }
 0x797   :  { %1497 = vmatpush3.bf16.msra.mxu0 %v1203_v41 }
 0x798   :  { %1498 = vmatprep.subr.bf16.mxu0 %v1646_v26 }
 0x79b   :  { %1499 = vmatpush3.bf16.msra.mxu0 %v1204_v24 }
 0x79c   :  { %1500 = vmatprep.subr.bf16.mxu0 %v1646_v26 }
 0x79f   :  { %1501 = vmatpush3.bf16.msra.mxu0 %v1205_v31 }
 0x7a0   :  { %1502 = vmatprep.subr.bf16.mxu0 %v1646_v26 }
 0x7a3   :  { %1503 = vmatpush3.bf16.msra.mxu0 %v1206_v37 }
 0x7a4   :  { %1504 = vmatprep.subr.bf16.mxu0 %v1646_v26 }
 0x7a7   :  { %1505 = vmatpush3.bf16.msra.mxu0 %v1207_v63 }
 0x7ef   :  { %v1059_v2 = vpop.trf.xlu1 }
 0x7f0   :  { %1467 = vmatmul.mubr.msk.bf16.vlgmr.msra.gmra.mrb[16].mxu1 %vm124_vm0, %v1059_v2 }
 0x7f1   :  { %1471 = vmatpush3.bf16.msra.mxu1 %v1127_v58  ;;  %1486 = vmatprep.mubr.msk.bf16.mxu1 %vm1648_vm2, %v1646_v26 }
 0x7f2   :  { %1472 = vmatprep.subr.bf16.mxu1 %v1646_v26 }
 0x7f5   :  { %1473 = vmatpush3.bf16.msra.mxu1 %v1128_v4 }
 0x7f6   :  { %1474 = vmatprep.subr.bf16.mxu1 %v1646_v26 }
 0x7f9   :  { %1475 = vmatpush3.bf16.msra.mxu1 %v1129_v56 }
 0x7fa   :  { %1476 = vmatprep.subr.bf16.mxu1 %v1646_v26 }
 0x7fd   :  { %1477 = vmatpush3.bf16.msra.mxu1 %v1130_v7 }
 0x7fe   :  { %1478 = vmatprep.subr.bf16.mxu1 %v1646_v26 }
 0x801   :  { %1479 = vmatpush3.bf16.msra.mxu1 %v1131_v12 }
 0x802   :  { %1480 = vmatprep.subr.bf16.mxu1 %v1646_v26 }
 0x805   :  { %1481 = vmatpush3.bf16.msra.mxu1 %v1132_v54 }
 0x806   :  { %1482 = vmatprep.subr.bf16.mxu1 %v1646_v26 }
 0x809   :  { %1483 = vmatpush3.bf16.msra.mxu1 %v1133_v8 }
 0x80a   :  { %1484 = vmatprep.subr.bf16.mxu1 %v1646_v26 }
 0x80d   :  { %1485 = vmatpush3.bf16.msra.mxu1 %v1134_v22 }
 0x8c3   :  { %v1104_v32 = vpop.f32.mrb[16].mxu1 }
 0x8c4   :  { %v1110_v50 = vpack.c.bf16 %v1104_v32, %v1104_v32  ;;  %v1468_v33 = vpop.f32.mrb[17].mxu1 }
 0x8c5   :  { %v1107_v34 = vpop.f32.mrb[18].mxu1 }
 0x8c6   :  { %v1469_v35 = vpop.f32.mrb[19].mxu1  ;;  %1487 = vmatmul.mubr.bf16.vlgmr.msra.gmra.mrb[20].mxu1 %v1110_v50 }
 0x999   :  { %v1176_v23 = vpop.f32.mrb[20].mxu1 }
 0x99a   :  { %v1177_v27 = vadd.f32 %v1295_v47, %v1176_v23  ;;  %v1488_v42 = vpop.f32.mrb[21].mxu1 }
 0x99b   :  { %v1179_v43 = vpop.f32.mrb[22].mxu1 }
 0x99c   :  { %v1182_v44 = vmax.f32 %v1177_v27, 0.0  ;;  %v1489_v46 = vpop.f32.mrb[23].mxu1 }
 0x99e   :  { %v1183_v48 = vpack.c.bf16 %v1182_v44, %v1182_v44 }
 0x9a0   :  { %1507 = vmatmul.mubr.bf16.vlgmr.msra.gmra.mrb[24].mxu0 %v1183_v48 }
 0xa73   :  { %v1249_v26 = vpop.f32.mrb[24].mxu0 }
 0xa74   :  { %v1250_v52 = vadd.f32 %v1296_v49, %v1249_v26  ;;  %v1508_v57 = vpop.f32.mrb[25].mxu0 }
 0xa75   :  { %v1252_v58 = vpop.f32.mrb[26].mxu0 }
 0xa76   :  { %v1509_v59 = vpop.f32.mrb[27].mxu0  ;;  %1256 = vst.msk [vmem:[#allocation8] sm:$0x3] %vm1255_vm12, %v1250_v52 }
 0xa77   :  { %1625 = shalt.err (!%p1622_p6)
}
 0xa78   :  { %s1626_s18 = scalar_lea.hbm %s2312_s19, 32 }
 0xa79   :  { %p1627_p7 = scmp.ne.s32.totalorder %s2312_s19, %s1626_s18  ;;  %p1630_p8 = scmp.lt.u32.totalorder %s1626_s18, %s2312_s19 }
 0xa7b   :  { %p1632_p9 = pnand %p1630_p8, %p1627_p7 }
 0xa7d   :  { %1635 = shalt.err (!%p1632_p9)
}
 0xa7e   :  { %1266 = dma.vmem_to_hbm [thread:$0]  %s1264_s30, 32, %s2312_s19, [#allocation5]  }
 0xa7f   :  { %1640 = dma.done.wait [#allocation5], 32  }
 0xa80   :  { %1641 = vsyncadd [#allocation5], 4294967264 }
 0xa81   :  { %1270 = vsyncpa [#allocation4], 1 }
 0xa82   :  { %1271 = vsyncpa [#allocation7], 1 }
 0xa83   :  { %1272 = vsyncpa [#allocation5], 1 }

</bundles_post_ra>
